<compile_context>
chip_gen: v7x
topology: tpu7x:2x2x1
jax: 0.10.0
libtpu: 0.0.40
codegen_flags: <defaults>
</compile_context>

<pallas_src>
import math
from functools import partial

import jax
import jax.numpy as jnp
from jax import lax
from jax.experimental import pallas as pl
from jax.experimental.pallas import tpu as pltpu


def _choose_tile(length, preferred, granule):
    """Largest divisor of `length` <= `preferred` that is a multiple of
    `granule`; falls back to the full length (full-extent blocks are always
    legal w.r.t. the (8,128) constraint)."""
    if length <= preferred:
        return length
    for t in range(preferred, 0, -1):
        if length % t == 0 and t % granule == 0:
            return t
    return length


# ---------------------------------------------------------------------------
# Single fused kernel: per-head projections + flash attention + fc_out.
# Grid = (N, Lq//tq, Lk//tk)   with dims ("parallel", "parallel", "arbitrary").
# ---------------------------------------------------------------------------
def _fused_attention_kernel(qx_ref, kx_ref, vx_ref, mask_ref,
                            wq_ref, wk_ref, wv_ref, wfc_ref, b_ref,
                            o_ref,
                            qproj_s, m_s, l_s, acc_s,
                            *, heads, head_dim, mask_heads):
    j = pl.program_id(2)
    nk = pl.num_programs(2)

    @pl.when(j == 0)
    def _init():
        # Project Q once per (batch, q-tile): (tq,E) @ block-diag(E,E), scale
        # already folded into the weight.  Reused across every kv step.
        qproj_s[...] = jnp.dot(
            qx_ref[0], wq_ref[...],
            preferred_element_type=jnp.float32).astype(jnp.bfloat16)
        m_s[...] = jnp.full(m_s.shape, -jnp.inf, m_s.dtype)
        l_s[...] = jnp.zeros(l_s.shape, l_s.dtype)
        acc_s[...] = jnp.zeros(acc_s.shape, acc_s.dtype)

    # Project K / V for this kv tile (block-diagonal weights, bf16 MXU).
    kp = jnp.dot(kx_ref[0], wk_ref[...],
                 preferred_element_type=jnp.float32).astype(jnp.bfloat16)
    vp = jnp.dot(vx_ref[0], wv_ref[...],
                 preferred_element_type=jnp.float32).astype(jnp.bfloat16)

    qp = qproj_s[...]                      # (tq, H*D) bf16, pre-scaled
    mask = mask_ref[0]                     # (mH, tq, tk) bf16
    shared_mask = mask[0].astype(jnp.float32) if mask_heads == 1 else None

    for h in range(heads):                 # static unroll over heads
        lo, hi = h * head_dim, (h + 1) * head_dim
        q_h = qp[:, lo:hi]                 # (tq, D)
        k_h = kp[:, lo:hi]                 # (tk, D)
        v_h = vp[:, lo:hi]                 # (tk, D)

        # scores = (q*scale) @ k^T, contracted on last dims (no transpose)
        s = lax.dot_general(q_h, k_h, (((1,), (1,)), ((), ())),
                            preferred_element_type=jnp.float32)   # (tq, tk)
        m_blk = shared_mask if mask_heads == 1 else mask[h].astype(jnp.float32)
        s = s * m_blk                      # multiplicative mask (module semantics)

        # Online softmax update (flash style).
        m_prev = m_s[h]                                         # (tq, 1)
        m_new = jnp.maximum(m_prev, jnp.max(s, axis=-1, keepdims=True))
        alpha = jnp.exp(m_prev - m_new)
        p = jnp.exp(s - m_new)
        l_s[h] = alpha * l_s[h] + jnp.sum(p, axis=-1, keepdims=True)
        m_s[h] = m_new
        ctx = jnp.dot(p.astype(jnp.bfloat16), v_h,
                      preferred_element_type=jnp.float32)        # (tq, D)
        acc_s[:, lo:hi] = alpha * acc_s[:, lo:hi] + ctx

    @pl.when(j == nk - 1)
    def _epilogue():
        # Normalize each head's context, then ONE (tq,H*D)@(H*D,E_out) matmul.
        for h in range(heads):
            lo, hi = h * head_dim, (h + 1) * head_dim
            inv = pl.reciprocal(l_s[h], approx=True)             # EUP slot
            acc_s[:, lo:hi] = acc_s[:, lo:hi] * inv
        ctx_all = acc_s[...].astype(jnp.bfloat16)                # (tq, H*D)
        out = jnp.dot(ctx_all, wfc_ref[...],
                      preferred_element_type=jnp.float32)        # (tq, E_out)
        o_ref[0] = (out + b_ref[...]).astype(o_ref.dtype)        # lane-dense store


# ---------------------------------------------------------------------------
# Module-level wrapper (mirrors Attention.forward)
# ---------------------------------------------------------------------------
def attention_forward(params, values, keys, query, mask, *, embed_size, heads):
    N, Lq, E = query.shape
    Lk = keys.shape[1]
    Lv = values.shape[1]
    assert Lk == Lv, "key/value lengths must match for attention @ V"
    D = embed_size // heads
    assert heads * D == E == embed_size
    E_out = params["w_fc"].shape[0]

    # Host-side weight prep (one-time constant folds, no in-kernel transposes).
    scale = 1.0 / math.sqrt(embed_size)
    eye = jnp.eye(heads, dtype=jnp.float32)
    wq_bd = (jnp.kron(eye, params["wq"].T) * scale).astype(jnp.bfloat16)  # (E,E)
    wk_bd = jnp.kron(eye, params["wk"].T).astype(jnp.bfloat16)            # (E,E)
    wv_bd = jnp.kron(eye, params["wv"].T).astype(jnp.bfloat16)            # (E,E)
    wfc_t = params["w_fc"].T.astype(jnp.bfloat16)                         # (E,E_out)
    b2d = params["b_fc"].reshape(1, E_out).astype(jnp.float32)

    # bf16 MXU operands (f32 accumulation inside the kernel).
    qx = query.astype(jnp.bfloat16)
    kx = keys.astype(jnp.bfloat16)
    vx = values.astype(jnp.bfloat16)

    mN, mH, mLq, mLk = mask.shape
    assert mLq == Lq and mLk == Lk and mN in (1, N) and mH in (1, heads)
    mask_b = mask.astype(jnp.bfloat16)       # 0/1 mask: exact in bf16, half the DMA

    # Tiles: q rows in (parallel) tiles, kv in (arbitrary) flash tiles.
    tq = _choose_tile(Lq, 256, 8)
    tk = _choose_tile(Lk, 512, 128)
    nq = Lq // tq
    nk = Lk // tk

    mask_index = ((lambda n, i, j: (n, 0, i, j)) if mN > 1
                  else (lambda n, i, j: (0, 0, i, j)))

    kernel = partial(_fused_attention_kernel, heads=heads, head_dim=D,
                     mask_heads=mH)

    return pl.pallas_call(
        kernel,
        out_shape=jax.ShapeDtypeStruct((N, Lq, E_out), jnp.float32),
        grid_spec=pltpu.PrefetchScalarGridSpec(
            num_scalar_prefetch=0,
            grid=(N, nq, nk),
            in_specs=[
                pl.BlockSpec((1, tq, E), lambda n, i, j: (n, i, 0)),     # query
                pl.BlockSpec((1, tk, E), lambda n, i, j: (n, j, 0)),     # keys
                pl.BlockSpec((1, tk, E), lambda n, i, j: (n, j, 0)),     # values
                pl.BlockSpec((1, mH, tq, tk), mask_index),               # mask tile
                pl.BlockSpec((E, E), lambda n, i, j: (0, 0)),            # Wq (resident)
                pl.BlockSpec((E, E), lambda n, i, j: (0, 0)),            # Wk (resident)
                pl.BlockSpec((E, E), lambda n, i, j: (0, 0)),            # Wv (resident)
                pl.BlockSpec((E, E_out), lambda n, i, j: (0, 0)),        # Wfc (resident)
                pl.BlockSpec((1, E_out), lambda n, i, j: (0, 0)),        # bias
            ],
            out_specs=pl.BlockSpec((1, tq, E_out), lambda n, i, j: (n, i, 0)),
            scratch_shapes=[
                pltpu.VMEM((tq, E), jnp.bfloat16),        # projected q (resident over kv)
                pltpu.VMEM((heads, tq, 1), jnp.float32),  # running max m
                pltpu.VMEM((heads, tq, 1), jnp.float32),  # running denom l
                pltpu.VMEM((tq, E), jnp.float32),         # context accumulator
            ],
        ),
        compiler_params=pltpu.CompilerParams(
            dimension_semantics=("parallel", "parallel", "arbitrary"),
            vmem_limit_bytes=56 * 1024 * 1024,
        ),
    )(qx, kx, vx, mask_b, wq_bd, wk_bd, wv_bd, wfc_t, b2d)


def init_params(key, embed_size, heads):
    D = embed_size // heads
    k1, k2, k3, k4, k5 = jax.random.split(key, 5)
    # nn.Linear default init: U(-1/sqrt(fan_in), 1/sqrt(fan_in))
    lim_d = 1.0 / math.sqrt(D)
    lim_e = 1.0 / math.sqrt(heads * D)
    return {
        "wq": jax.random.uniform(k1, (D, D), jnp.float32, -lim_d, lim_d),
        "wk": jax.random.uniform(k2, (D, D), jnp.float32, -lim_d, lim_d),
        "wv": jax.random.uniform(k3, (D, D), jnp.float32, -lim_d, lim_d),
        "w_fc": jax.random.uniform(k4, (embed_size, heads * D), jnp.float32,
                                   -lim_e, lim_e),
        "b_fc": jax.random.uniform(k5, (embed_size,), jnp.float32,
                                   -lim_e, lim_e),
    }


# Pure-JAX reference mirroring the PyTorch forward (for the correctness check).
def _reference(params, values, keys, query, mask, *, embed_size, heads):
    N, Lq, _ = query.shape
    Lk, Lv = keys.shape[1], values.shape[1]
    D = embed_size // heads
    v = values.reshape(N, Lv, heads, D) @ params["wv"].T
    k = keys.reshape(N, Lk, heads, D) @ params["wk"].T
    q = query.reshape(N, Lq, heads, D) @ params["wq"].T
    energy = jnp.einsum("nqhd,nkhd->nhqk", q, k)
    energy = energy * mask
    attn = jax.nn.softmax(energy / (embed_size ** 0.5), axis=3)
    out = jnp.einsum("nhql,nlhd->nqhd", attn, v).reshape(N, Lq, heads * D)
    return out @ params["w_fc"].T + params["b_fc"]


if __name__ == "__main__":
    embed_size, heads = 32, 4
    N, seq = 2, 8

    key = jax.random.PRNGKey(0)
    kp_, kv_, kk_, kq_, km_ = jax.random.split(key, 5)

    params = init_params(kp_, embed_size, heads)
    values = jax.random.normal(kv_, (N, seq, embed_size), jnp.float32)
    keys = jax.random.normal(kk_, (N, seq, embed_size), jnp.float32)
    query = jax.random.normal(kq_, (N, seq, embed_size), jnp.float32)
    # multiplicative 0/1 mask, shape (N, heads, Lq, Lk)
    mask = (jax.random.uniform(km_, (N, heads, seq, seq)) > 0.2).astype(jnp.float32)

    out = attention_forward(params, values, keys, query, mask,
                            embed_size=embed_size, heads=heads)
    out = jax.block_until_ready(out)
    assert out.shape == (N, seq, embed_size)

    # Reference computed from bf16-quantized operands (the kernel runs bf16 MXU
    # operands with f32 accumulation), f32 math otherwise.
    q8 = lambda x: x.astype(jnp.bfloat16).astype(jnp.float32)
    params_q = {k_: q8(v_) for k_, v_ in params.items()}
    ref = _reference(params_q, q8(values), q8(keys), q8(query), q8(mask),
                     embed_size=embed_size, heads=heads)
    assert jnp.allclose(out, ref, rtol=2e-2, atol=2e-2), \
        float(jnp.max(jnp.abs(out - ref)))

    print("KERNEL_OK")
</pallas_src>

<mosaic_0001>
module attributes {stable_mosaic.version = 11 : i64} {
  func.func @_fused_attention_kernel(%arg0: i32, %arg1: i32, %arg2: i32, %arg3: memref<1x8x32xbf16, #tpu.memory_space<vmem>>, %arg4: memref<1x8x32xbf16, #tpu.memory_space<vmem>>, %arg5: memref<1x8x32xbf16, #tpu.memory_space<vmem>>, %arg6: memref<1x4x8x8xbf16, #tpu.memory_space<vmem>>, %arg7: memref<32x32xbf16, #tpu.memory_space<vmem>>, %arg8: memref<32x32xbf16, #tpu.memory_space<vmem>>, %arg9: memref<32x32xbf16, #tpu.memory_space<vmem>>, %arg10: memref<32x32xbf16, #tpu.memory_space<vmem>>, %arg11: memref<1x32xf32, #tpu.memory_space<vmem>>, %arg12: memref<1x8x32xf32, #tpu.memory_space<vmem>>, %arg13: memref<8x32xbf16, #tpu.memory_space<vmem>>, %arg14: memref<4x8x1xf32, #tpu.memory_space<vmem>>, %arg15: memref<4x8x1xf32, #tpu.memory_space<vmem>>, %arg16: memref<8x32xf32, #tpu.memory_space<vmem>>) attributes {dimension_semantics = [#tpu.dimension_semantics<parallel>, #tpu.dimension_semantics<parallel>, #tpu.dimension_semantics<arbitrary>], iteration_bounds = array<i64: 2, 1, 1>, scalar_prefetch = 0 : i64, scratch_operands = 4 : i64, tpu.core_type = #tpu.core_type<tc>, window_params = [{transform_indices = @transform_0, window_bounds = array<i64: 1, 8, 32>}, {transform_indices = @transform_1, window_bounds = array<i64: 1, 8, 32>}, {transform_indices = @transform_2, window_bounds = array<i64: 1, 8, 32>}, {transform_indices = @transform_3, window_bounds = array<i64: 1, 4, 8, 8>}, {pipeline_mode = #tpu.pipeline_mode<synchronous>, transform_indices = @transform_4, window_bounds = array<i64: 32, 32>}, {pipeline_mode = #tpu.pipeline_mode<synchronous>, transform_indices = @transform_5, window_bounds = array<i64: 32, 32>}, {pipeline_mode = #tpu.pipeline_mode<synchronous>, transform_indices = @transform_6, window_bounds = array<i64: 32, 32>}, {pipeline_mode = #tpu.pipeline_mode<synchronous>, transform_indices = @transform_7, window_bounds = array<i64: 32, 32>}, {pipeline_mode = #tpu.pipeline_mode<synchronous>, transform_indices = @transform_8, window_bounds = array<i64: 1, 32>}, {transform_indices = @transform_9, window_bounds = array<i64: 1, 8, 32>}]} {
    %c0_i32 = arith.constant 0 : i32
    %0 = arith.cmpi eq, %arg2, %c0_i32 : i32
    %1 = arith.extui %0 : i1 to i32
    %c0_i32_0 = arith.constant 0 : i32
    %2 = arith.cmpi ne, %1, %c0_i32_0 : i32
    scf.if %2 {
      %c0_93 = arith.constant 0 : index
      %c0_94 = arith.constant 0 : index
      %c0_95 = arith.constant 0 : index
      %167 = vector.load %arg3[%c0_93, %c0_94, %c0_95] : memref<1x8x32xbf16, #tpu.memory_space<vmem>>, vector<1x8x32xbf16>
      %168 = vector.shape_cast %167 : vector<1x8x32xbf16> to vector<8x32xbf16>
      %c0_96 = arith.constant 0 : index
      %c0_97 = arith.constant 0 : index
      %169 = vector.load %arg7[%c0_96, %c0_97] : memref<32x32xbf16, #tpu.memory_space<vmem>>, vector<32x32xbf16>
      %cst_98 = arith.constant dense<0.000000e+00> : vector<8x32xf32>
      %170 = tpu.matmul %168, %169, %cst_98 {dimension_numbers = #tpu.dot_dimension_numbers<[1], [0], [0], [1], [0, 0, 1, 1], [], []>} : vector<8x32xbf16>, vector<32x32xbf16>, vector<8x32xf32> -> vector<8x32xf32>
      %171 = arith.truncf %170 : vector<8x32xf32> to vector<8x32xbf16>
      %c0_99 = arith.constant 0 : index
      %c0_100 = arith.constant 0 : index
      %172 = vector.load %arg13[%c0_99, %c0_100] : memref<8x32xbf16, #tpu.memory_space<vmem>>, vector<8x32xbf16>
      tpu.vector_store %arg13[%c0_99, %c0_100], %171 {strides = array<i32>} : memref<8x32xbf16, #tpu.memory_space<vmem>>, vector<8x32xbf16>,
      %cst_101 = arith.constant 0xFF800000 : f32
      %173 = vector.broadcast %cst_101 : f32 to vector<4x8x1xf32>
      %c0_102 = arith.constant 0 : index
      %c0_103 = arith.constant 0 : index
      %c0_104 = arith.constant 0 : index
      %174 = vector.load %arg14[%c0_102, %c0_103, %c0_104] : memref<4x8x1xf32, #tpu.memory_space<vmem>>, vector<4x8x1xf32>
      tpu.vector_store %arg14[%c0_102, %c0_103, %c0_104], %173 {strides = array<i32>} : memref<4x8x1xf32, #tpu.memory_space<vmem>>, vector<4x8x1xf32>,
      %cst_105 = arith.constant 0.000000e+00 : f32
      %175 = vector.broadcast %cst_105 : f32 to vector<4x8x1xf32>
      %c0_106 = arith.constant 0 : index
      %c0_107 = arith.constant 0 : index
      %c0_108 = arith.constant 0 : index
      %176 = vector.load %arg15[%c0_106, %c0_107, %c0_108] : memref<4x8x1xf32, #tpu.memory_space<vmem>>, vector<4x8x1xf32>
      tpu.vector_store %arg15[%c0_106, %c0_107, %c0_108], %175 {strides = array<i32>} : memref<4x8x1xf32, #tpu.memory_space<vmem>>, vector<4x8x1xf32>,
      %cst_109 = arith.constant 0.000000e+00 : f32
      %177 = vector.broadcast %cst_109 : f32 to vector<8x32xf32>
      %c0_110 = arith.constant 0 : index
      %c0_111 = arith.constant 0 : index
      %178 = vector.load %arg16[%c0_110, %c0_111] : memref<8x32xf32, #tpu.memory_space<vmem>>, vector<8x32xf32>
      tpu.vector_store %arg16[%c0_110, %c0_111], %177 {strides = array<i32>} : memref<8x32xf32, #tpu.memory_space<vmem>>, vector<8x32xf32>,
    } else {
    }
    %c0 = arith.constant 0 : index
    %c0_1 = arith.constant 0 : index
    %c0_2 = arith.constant 0 : index
    %3 = vector.load %arg4[%c0, %c0_1, %c0_2] : memref<1x8x32xbf16, #tpu.memory_space<vmem>>, vector<1x8x32xbf16>
    %4 = vector.shape_cast %3 : vector<1x8x32xbf16> to vector<8x32xbf16>
    %c0_3 = arith.constant 0 : index
    %c0_4 = arith.constant 0 : index
    %5 = vector.load %arg8[%c0_3, %c0_4] : memref<32x32xbf16, #tpu.memory_space<vmem>>, vector<32x32xbf16>
    %cst = arith.constant dense<0.000000e+00> : vector<8x32xf32>
    %6 = tpu.matmul %4, %5, %cst {dimension_numbers = #tpu.dot_dimension_numbers<[1], [0], [0], [1], [0, 0, 1, 1], [], []>} : vector<8x32xbf16>, vector<32x32xbf16>, vector<8x32xf32> -> vector<8x32xf32>
    %7 = arith.truncf %6 : vector<8x32xf32> to vector<8x32xbf16>
    %c0_5 = arith.constant 0 : index
    %c0_6 = arith.constant 0 : index
    %c0_7 = arith.constant 0 : index
    %8 = vector.load %arg5[%c0_5, %c0_6, %c0_7] : memref<1x8x32xbf16, #tpu.memory_space<vmem>>, vector<1x8x32xbf16>
    %9 = vector.shape_cast %8 : vector<1x8x32xbf16> to vector<8x32xbf16>
    %c0_8 = arith.constant 0 : index
    %c0_9 = arith.constant 0 : index
    %10 = vector.load %arg9[%c0_8, %c0_9] : memref<32x32xbf16, #tpu.memory_space<vmem>>, vector<32x32xbf16>
    %cst_10 = arith.constant dense<0.000000e+00> : vector<8x32xf32>
    %11 = tpu.matmul %9, %10, %cst_10 {dimension_numbers = #tpu.dot_dimension_numbers<[1], [0], [0], [1], [0, 0, 1, 1], [], []>} : vector<8x32xbf16>, vector<32x32xbf16>, vector<8x32xf32> -> vector<8x32xf32>
    %12 = arith.truncf %11 : vector<8x32xf32> to vector<8x32xbf16>
    %c0_11 = arith.constant 0 : index
    %c0_12 = arith.constant 0 : index
    %13 = vector.load %arg13[%c0_11, %c0_12] : memref<8x32xbf16, #tpu.memory_space<vmem>>, vector<8x32xbf16>
    %c0_13 = arith.constant 0 : index
    %c0_14 = arith.constant 0 : index
    %c0_15 = arith.constant 0 : index
    %c0_16 = arith.constant 0 : index
    %14 = vector.load %arg6[%c0_13, %c0_14, %c0_15, %c0_16] : memref<1x4x8x8xbf16, #tpu.memory_space<vmem>>, vector<1x4x8x8xbf16>
    %15 = vector.shape_cast %14 : vector<1x4x8x8xbf16> to vector<4x8x8xbf16>
    %16 = vector.extract_strided_slice %13 {offsets = [0, 0], sizes = [8, 8], strides = [1, 1]} : vector<8x32xbf16> to vector<8x8xbf16>
    %17 = vector.extract_strided_slice %7 {offsets = [0, 0], sizes = [8, 8], strides = [1, 1]} : vector<8x32xbf16> to vector<8x8xbf16>
    %18 = vector.extract_strided_slice %12 {offsets = [0, 0], sizes = [8, 8], strides = [1, 1]} : vector<8x32xbf16> to vector<8x8xbf16>
    %cst_17 = arith.constant dense<0.000000e+00> : vector<8x8xf32>
    %19 = tpu.matmul %16, %17, %cst_17 {dimension_numbers = #tpu.dot_dimension_numbers<[1], [1], [0], [0], [0, 0, 1, 0], [], []>} : vector<8x8xbf16>, vector<8x8xbf16>, vector<8x8xf32> -> vector<8x8xf32>
    %20 = vector.extract_strided_slice %15 {offsets = [0, 0, 0], sizes = [1, 8, 8], strides = [1, 1, 1]} : vector<4x8x8xbf16> to vector<1x8x8xbf16>
    %21 = vector.shape_cast %20 : vector<1x8x8xbf16> to vector<8x8xbf16>
    %22 = arith.extf %21 : vector<8x8xbf16> to vector<8x8xf32>
    %23 = arith.mulf %19, %22 : vector<8x8xf32>
    %c0_18 = arith.constant 0 : index
    %c0_19 = arith.constant 0 : index
    %c0_20 = arith.constant 0 : index
    %24 = vector.load %arg14[%c0_18, %c0_19, %c0_20] : memref<4x8x1xf32, #tpu.memory_space<vmem>>, vector<1x8x1xf32>
    %25 = vector.shape_cast %24 : vector<1x8x1xf32> to vector<8x1xf32>
    %cst_21 = arith.constant dense<0xFF800000> : vector<8xf32>
    %26 = vector.multi_reduction <maximumf>, %23, %cst_21 [1] : vector<8x8xf32> to vector<8xf32>
    %27 = vector.shape_cast %26 : vector<8xf32> to vector<8x1xf32>
    %28 = arith.maximumf %25, %27 : vector<8x1xf32>
    %29 = arith.subf %25, %28 : vector<8x1xf32>
    %30 = math.exp %29 : vector<8x1xf32>
    %31 = vector.broadcast %28 : vector<8x1xf32> to vector<8x8xf32>
    %32 = arith.subf %23, %31 : vector<8x8xf32>
    %33 = math.exp %32 : vector<8x8xf32>
    %c0_22 = arith.constant 0 : index
    %c0_23 = arith.constant 0 : index
    %c0_24 = arith.constant 0 : index
    %34 = vector.load %arg15[%c0_22, %c0_23, %c0_24] : memref<4x8x1xf32, #tpu.memory_space<vmem>>, vector<1x8x1xf32>
    %35 = vector.shape_cast %34 : vector<1x8x1xf32> to vector<8x1xf32>
    %36 = arith.mulf %30, %35 : vector<8x1xf32>
    %cst_25 = arith.constant dense<0.000000e+00> : vector<8xf32>
    %37 = vector.multi_reduction <add>, %33, %cst_25 [1] : vector<8x8xf32> to vector<8xf32>
    %38 = vector.shape_cast %37 : vector<8xf32> to vector<8x1xf32>
    %39 = arith.addf %36, %38 : vector<8x1xf32>
    %c0_26 = arith.constant 0 : index
    %c0_27 = arith.constant 0 : index
    %c0_28 = arith.constant 0 : index
    %40 = vector.load %arg15[%c0_26, %c0_27, %c0_28] : memref<4x8x1xf32, #tpu.memory_space<vmem>>, vector<1x8x1xf32>
    %41 = vector.shape_cast %40 : vector<1x8x1xf32> to vector<8x1xf32>
    %42 = vector.shape_cast %39 : vector<8x1xf32> to vector<1x8x1xf32>
    tpu.vector_store %arg15[%c0_26, %c0_27, %c0_28], %42 {strides = array<i32>} : memref<4x8x1xf32, #tpu.memory_space<vmem>>, vector<1x8x1xf32>,
    %c0_29 = arith.constant 0 : index
    %c0_30 = arith.constant 0 : index
    %c0_31 = arith.constant 0 : index
    %43 = vector.load %arg14[%c0_29, %c0_30, %c0_31] : memref<4x8x1xf32, #tpu.memory_space<vmem>>, vector<1x8x1xf32>
    %44 = vector.shape_cast %43 : vector<1x8x1xf32> to vector<8x1xf32>
    %45 = vector.shape_cast %28 : vector<8x1xf32> to vector<1x8x1xf32>
    tpu.vector_store %arg14[%c0_29, %c0_30, %c0_31], %45 {strides = array<i32>} : memref<4x8x1xf32, #tpu.memory_space<vmem>>, vector<1x8x1xf32>,
    %46 = arith.truncf %33 : vector<8x8xf32> to vector<8x8xbf16>
    %cst_32 = arith.constant dense<0.000000e+00> : vector<8x8xf32>
    %47 = tpu.matmul %46, %18, %cst_32 {dimension_numbers = #tpu.dot_dimension_numbers<[1], [0], [0], [1], [0, 0, 1, 1], [], []>} : vector<8x8xbf16>, vector<8x8xbf16>, vector<8x8xf32> -> vector<8x8xf32>
    %c0_33 = arith.constant 0 : index
    %c0_34 = arith.constant 0 : index
    %48 = vector.load %arg16[%c0_33, %c0_34] : memref<8x32xf32, #tpu.memory_space<vmem>>, vector<8x8xf32>
    %49 = vector.broadcast %30 : vector<8x1xf32> to vector<8x8xf32>
    %50 = arith.mulf %49, %48 : vector<8x8xf32>
    %51 = arith.addf %50, %47 : vector<8x8xf32>
    %c0_35 = arith.constant 0 : index
    %c0_36 = arith.constant 0 : index
    %52 = vector.load %arg16[%c0_35, %c0_36] : memref<8x32xf32, #tpu.memory_space<vmem>>, vector<8x8xf32>
    tpu.vector_store %arg16[%c0_35, %c0_36], %51 {strides = array<i32>} : memref<8x32xf32, #tpu.memory_space<vmem>>, vector<8x8xf32>,
    %53 = vector.extract_strided_slice %13 {offsets = [0, 8], sizes = [8, 8], strides = [1, 1]} : vector<8x32xbf16> to vector<8x8xbf16>
    %54 = vector.extract_strided_slice %7 {offsets = [0, 8], sizes = [8, 8], strides = [1, 1]} : vector<8x32xbf16> to vector<8x8xbf16>
    %55 = vector.extract_strided_slice %12 {offsets = [0, 8], sizes = [8, 8], strides = [1, 1]} : vector<8x32xbf16> to vector<8x8xbf16>
    %cst_37 = arith.constant dense<0.000000e+00> : vector<8x8xf32>
    %56 = tpu.matmul %53, %54, %cst_37 {dimension_numbers = #tpu.dot_dimension_numbers<[1], [1], [0], [0], [0, 0, 1, 0], [], []>} : vector<8x8xbf16>, vector<8x8xbf16>, vector<8x8xf32> -> vector<8x8xf32>
    %57 = vector.extract_strided_slice %15 {offsets = [1, 0, 0], sizes = [1, 8, 8], strides = [1, 1, 1]} : vector<4x8x8xbf16> to vector<1x8x8xbf16>
    %58 = vector.shape_cast %57 : vector<1x8x8xbf16> to vector<8x8xbf16>
    %59 = arith.extf %58 : vector<8x8xbf16> to vector<8x8xf32>
    %60 = arith.mulf %56, %59 : vector<8x8xf32>
    %c1 = arith.constant 1 : index
    %c0_38 = arith.constant 0 : index
    %c0_39 = arith.constant 0 : index
    %61 = vector.load %arg14[%c1, %c0_38, %c0_39] : memref<4x8x1xf32, #tpu.memory_space<vmem>>, vector<1x8x1xf32>
    %62 = vector.shape_cast %61 : vector<1x8x1xf32> to vector<8x1xf32>
    %cst_40 = arith.constant dense<0xFF800000> : vector<8xf32>
    %63 = vector.multi_reduction <maximumf>, %60, %cst_40 [1] : vector<8x8xf32> to vector<8xf32>
    %64 = vector.shape_cast %63 : vector<8xf32> to vector<8x1xf32>
    %65 = arith.maximumf %62, %64 : vector<8x1xf32>
    %66 = arith.subf %62, %65 : vector<8x1xf32>
    %67 = math.exp %66 : vector<8x1xf32>
    %68 = vector.broadcast %65 : vector<8x1xf32> to vector<8x8xf32>
    %69 = arith.subf %60, %68 : vector<8x8xf32>
    %70 = math.exp %69 : vector<8x8xf32>
    %c1_41 = arith.constant 1 : index
    %c0_42 = arith.constant 0 : index
    %c0_43 = arith.constant 0 : index
    %71 = vector.load %arg15[%c1_41, %c0_42, %c0_43] : memref<4x8x1xf32, #tpu.memory_space<vmem>>, vector<1x8x1xf32>
    %72 = vector.shape_cast %71 : vector<1x8x1xf32> to vector<8x1xf32>
    %73 = arith.mulf %67, %72 : vector<8x1xf32>
    %cst_44 = arith.constant dense<0.000000e+00> : vector<8xf32>
    %74 = vector.multi_reduction <add>, %70, %cst_44 [1] : vector<8x8xf32> to vector<8xf32>
    %75 = vector.shape_cast %74 : vector<8xf32> to vector<8x1xf32>
    %76 = arith.addf %73, %75 : vector<8x1xf32>
    %c1_45 = arith.constant 1 : index
    %c0_46 = arith.constant 0 : index
    %c0_47 = arith.constant 0 : index
    %77 = vector.load %arg15[%c1_45, %c0_46, %c0_47] : memref<4x8x1xf32, #tpu.memory_space<vmem>>, vector<1x8x1xf32>
    %78 = vector.shape_cast %77 : vector<1x8x1xf32> to vector<8x1xf32>
    %79 = vector.shape_cast %76 : vector<8x1xf32> to vector<1x8x1xf32>
    tpu.vector_store %arg15[%c1_45, %c0_46, %c0_47], %79 {strides = array<i32>} : memref<4x8x1xf32, #tpu.memory_space<vmem>>, vector<1x8x1xf32>,
    %c1_48 = arith.constant 1 : index
    %c0_49 = arith.constant 0 : index
    %c0_50 = arith.constant 0 : index
    %80 = vector.load %arg14[%c1_48, %c0_49, %c0_50] : memref<4x8x1xf32, #tpu.memory_space<vmem>>, vector<1x8x1xf32>
    %81 = vector.shape_cast %80 : vector<1x8x1xf32> to vector<8x1xf32>
    %82 = vector.shape_cast %65 : vector<8x1xf32> to vector<1x8x1xf32>
    tpu.vector_store %arg14[%c1_48, %c0_49, %c0_50], %82 {strides = array<i32>} : memref<4x8x1xf32, #tpu.memory_space<vmem>>, vector<1x8x1xf32>,
    %83 = arith.truncf %70 : vector<8x8xf32> to vector<8x8xbf16>
    %cst_51 = arith.constant dense<0.000000e+00> : vector<8x8xf32>
    %84 = tpu.matmul %83, %55, %cst_51 {dimension_numbers = #tpu.dot_dimension_numbers<[1], [0], [0], [1], [0, 0, 1, 1], [], []>} : vector<8x8xbf16>, vector<8x8xbf16>, vector<8x8xf32> -> vector<8x8xf32>
    %c0_52 = arith.constant 0 : index
    %c8 = arith.constant 8 : index
    %85 = vector.load %arg16[%c0_52, %c8] : memref<8x32xf32, #tpu.memory_space<vmem>>, vector<8x8xf32>
    %86 = vector.broadcast %67 : vector<8x1xf32> to vector<8x8xf32>
    %87 = arith.mulf %86, %85 : vector<8x8xf32>
    %88 = arith.addf %87, %84 : vector<8x8xf32>
    %c0_53 = arith.constant 0 : index
    %c8_54 = arith.constant 8 : index
    %89 = vector.load %arg16[%c0_53, %c8_54] : memref<8x32xf32, #tpu.memory_space<vmem>>, vector<8x8xf32>
    tpu.vector_store %arg16[%c0_53, %c8_54], %88 {strides = array<i32>} : memref<8x32xf32, #tpu.memory_space<vmem>>, vector<8x8xf32>,
    %90 = vector.extract_strided_slice %13 {offsets = [0, 16], sizes = [8, 8], strides = [1, 1]} : vector<8x32xbf16> to vector<8x8xbf16>
    %91 = vector.extract_strided_slice %7 {offsets = [0, 16], sizes = [8, 8], strides = [1, 1]} : vector<8x32xbf16> to vector<8x8xbf16>
    %92 = vector.extract_strided_slice %12 {offsets = [0, 16], sizes = [8, 8], strides = [1, 1]} : vector<8x32xbf16> to vector<8x8xbf16>
    %cst_55 = arith.constant dense<0.000000e+00> : vector<8x8xf32>
    %93 = tpu.matmul %90, %91, %cst_55 {dimension_numbers = #tpu.dot_dimension_numbers<[1], [1], [0], [0], [0, 0, 1, 0], [], []>} : vector<8x8xbf16>, vector<8x8xbf16>, vector<8x8xf32> -> vector<8x8xf32>
    %94 = vector.extract_strided_slice %15 {offsets = [2, 0, 0], sizes = [1, 8, 8], strides = [1, 1, 1]} : vector<4x8x8xbf16> to vector<1x8x8xbf16>
    %95 = vector.shape_cast %94 : vector<1x8x8xbf16> to vector<8x8xbf16>
    %96 = arith.extf %95 : vector<8x8xbf16> to vector<8x8xf32>
    %97 = arith.mulf %93, %96 : vector<8x8xf32>
    %c2 = arith.constant 2 : index
    %c0_56 = arith.constant 0 : index
    %c0_57 = arith.constant 0 : index
    %98 = vector.load %arg14[%c2, %c0_56, %c0_57] : memref<4x8x1xf32, #tpu.memory_space<vmem>>, vector<1x8x1xf32>
    %99 = vector.shape_cast %98 : vector<1x8x1xf32> to vector<8x1xf32>
    %cst_58 = arith.constant dense<0xFF800000> : vector<8xf32>
    %100 = vector.multi_reduction <maximumf>, %97, %cst_58 [1] : vector<8x8xf32> to vector<8xf32>
    %101 = vector.shape_cast %100 : vector<8xf32> to vector<8x1xf32>
    %102 = arith.maximumf %99, %101 : vector<8x1xf32>
    %103 = arith.subf %99, %102 : vector<8x1xf32>
    %104 = math.exp %103 : vector<8x1xf32>
    %105 = vector.broadcast %102 : vector<8x1xf32> to vector<8x8xf32>
    %106 = arith.subf %97, %105 : vector<8x8xf32>
    %107 = math.exp %106 : vector<8x8xf32>
    %c2_59 = arith.constant 2 : index
    %c0_60 = arith.constant 0 : index
    %c0_61 = arith.constant 0 : index
    %108 = vector.load %arg15[%c2_59, %c0_60, %c0_61] : memref<4x8x1xf32, #tpu.memory_space<vmem>>, vector<1x8x1xf32>
    %109 = vector.shape_cast %108 : vector<1x8x1xf32> to vector<8x1xf32>
    %110 = arith.mulf %104, %109 : vector<8x1xf32>
    %cst_62 = arith.constant dense<0.000000e+00> : vector<8xf32>
    %111 = vector.multi_reduction <add>, %107, %cst_62 [1] : vector<8x8xf32> to vector<8xf32>
    %112 = vector.shape_cast %111 : vector<8xf32> to vector<8x1xf32>
    %113 = arith.addf %110, %112 : vector<8x1xf32>
    %c2_63 = arith.constant 2 : index
    %c0_64 = arith.constant 0 : index
    %c0_65 = arith.constant 0 : index
    %114 = vector.load %arg15[%c2_63, %c0_64, %c0_65] : memref<4x8x1xf32, #tpu.memory_space<vmem>>, vector<1x8x1xf32>
    %115 = vector.shape_cast %114 : vector<1x8x1xf32> to vector<8x1xf32>
    %116 = vector.shape_cast %113 : vector<8x1xf32> to vector<1x8x1xf32>
    tpu.vector_store %arg15[%c2_63, %c0_64, %c0_65], %116 {strides = array<i32>} : memref<4x8x1xf32, #tpu.memory_space<vmem>>, vector<1x8x1xf32>,
    %c2_66 = arith.constant 2 : index
    %c0_67 = arith.constant 0 : index
    %c0_68 = arith.constant 0 : index
    %117 = vector.load %arg14[%c2_66, %c0_67, %c0_68] : memref<4x8x1xf32, #tpu.memory_space<vmem>>, vector<1x8x1xf32>
    %118 = vector.shape_cast %117 : vector<1x8x1xf32> to vector<8x1xf32>
    %119 = vector.shape_cast %102 : vector<8x1xf32> to vector<1x8x1xf32>
    tpu.vector_store %arg14[%c2_66, %c0_67, %c0_68], %119 {strides = array<i32>} : memref<4x8x1xf32, #tpu.memory_space<vmem>>, vector<1x8x1xf32>,
    %120 = arith.truncf %107 : vector<8x8xf32> to vector<8x8xbf16>
    %cst_69 = arith.constant dense<0.000000e+00> : vector<8x8xf32>
    %121 = tpu.matmul %120, %92, %cst_69 {dimension_numbers = #tpu.dot_dimension_numbers<[1], [0], [0], [1], [0, 0, 1, 1], [], []>} : vector<8x8xbf16>, vector<8x8xbf16>, vector<8x8xf32> -> vector<8x8xf32>
    %c0_70 = arith.constant 0 : index
    %c16 = arith.constant 16 : index
    %122 = vector.load %arg16[%c0_70, %c16] : memref<8x32xf32, #tpu.memory_space<vmem>>, vector<8x8xf32>
    %123 = vector.broadcast %104 : vector<8x1xf32> to vector<8x8xf32>
    %124 = arith.mulf %123, %122 : vector<8x8xf32>
    %125 = arith.addf %124, %121 : vector<8x8xf32>
    %c0_71 = arith.constant 0 : index
    %c16_72 = arith.constant 16 : index
    %126 = vector.load %arg16[%c0_71, %c16_72] : memref<8x32xf32, #tpu.memory_space<vmem>>, vector<8x8xf32>
    tpu.vector_store %arg16[%c0_71, %c16_72], %125 {strides = array<i32>} : memref<8x32xf32, #tpu.memory_space<vmem>>, vector<8x8xf32>,
    %127 = vector.extract_strided_slice %13 {offsets = [0, 24], sizes = [8, 8], strides = [1, 1]} : vector<8x32xbf16> to vector<8x8xbf16>
    %128 = vector.extract_strided_slice %7 {offsets = [0, 24], sizes = [8, 8], strides = [1, 1]} : vector<8x32xbf16> to vector<8x8xbf16>
    %129 = vector.extract_strided_slice %12 {offsets = [0, 24], sizes = [8, 8], strides = [1, 1]} : vector<8x32xbf16> to vector<8x8xbf16>
    %cst_73 = arith.constant dense<0.000000e+00> : vector<8x8xf32>
    %130 = tpu.matmul %127, %128, %cst_73 {dimension_numbers = #tpu.dot_dimension_numbers<[1], [1], [0], [0], [0, 0, 1, 0], [], []>} : vector<8x8xbf16>, vector<8x8xbf16>, vector<8x8xf32> -> vector<8x8xf32>
    %131 = vector.extract_strided_slice %15 {offsets = [3, 0, 0], sizes = [1, 8, 8], strides = [1, 1, 1]} : vector<4x8x8xbf16> to vector<1x8x8xbf16>
    %132 = vector.shape_cast %131 : vector<1x8x8xbf16> to vector<8x8xbf16>
    %133 = arith.extf %132 : vector<8x8xbf16> to vector<8x8xf32>
    %134 = arith.mulf %130, %133 : vector<8x8xf32>
    %c3 = arith.constant 3 : index
    %c0_74 = arith.constant 0 : index
    %c0_75 = arith.constant 0 : index
    %135 = vector.load %arg14[%c3, %c0_74, %c0_75] : memref<4x8x1xf32, #tpu.memory_space<vmem>>, vector<1x8x1xf32>
    %136 = vector.shape_cast %135 : vector<1x8x1xf32> to vector<8x1xf32>
    %cst_76 = arith.constant dense<0xFF800000> : vector<8xf32>
    %137 = vector.multi_reduction <maximumf>, %134, %cst_76 [1] : vector<8x8xf32> to vector<8xf32>
    %138 = vector.shape_cast %137 : vector<8xf32> to vector<8x1xf32>
    %139 = arith.maximumf %136, %138 : vector<8x1xf32>
    %140 = arith.subf %136, %139 : vector<8x1xf32>
    %141 = math.exp %140 : vector<8x1xf32>
    %142 = vector.broadcast %139 : vector<8x1xf32> to vector<8x8xf32>
    %143 = arith.subf %134, %142 : vector<8x8xf32>
    %144 = math.exp %143 : vector<8x8xf32>
    %c3_77 = arith.constant 3 : index
    %c0_78 = arith.constant 0 : index
    %c0_79 = arith.constant 0 : index
    %145 = vector.load %arg15[%c3_77, %c0_78, %c0_79] : memref<4x8x1xf32, #tpu.memory_space<vmem>>, vector<1x8x1xf32>
    %146 = vector.shape_cast %145 : vector<1x8x1xf32> to vector<8x1xf32>
    %147 = arith.mulf %141, %146 : vector<8x1xf32>
    %cst_80 = arith.constant dense<0.000000e+00> : vector<8xf32>
    %148 = vector.multi_reduction <add>, %144, %cst_80 [1] : vector<8x8xf32> to vector<8xf32>
    %149 = vector.shape_cast %148 : vector<8xf32> to vector<8x1xf32>
    %150 = arith.addf %147, %149 : vector<8x1xf32>
    %c3_81 = arith.constant 3 : index
    %c0_82 = arith.constant 0 : index
    %c0_83 = arith.constant 0 : index
    %151 = vector.load %arg15[%c3_81, %c0_82, %c0_83] : memref<4x8x1xf32, #tpu.memory_space<vmem>>, vector<1x8x1xf32>
    %152 = vector.shape_cast %151 : vector<1x8x1xf32> to vector<8x1xf32>
    %153 = vector.shape_cast %150 : vector<8x1xf32> to vector<1x8x1xf32>
    tpu.vector_store %arg15[%c3_81, %c0_82, %c0_83], %153 {strides = array<i32>} : memref<4x8x1xf32, #tpu.memory_space<vmem>>, vector<1x8x1xf32>,
    %c3_84 = arith.constant 3 : index
    %c0_85 = arith.constant 0 : index
    %c0_86 = arith.constant 0 : index
    %154 = vector.load %arg14[%c3_84, %c0_85, %c0_86] : memref<4x8x1xf32, #tpu.memory_space<vmem>>, vector<1x8x1xf32>
    %155 = vector.shape_cast %154 : vector<1x8x1xf32> to vector<8x1xf32>
    %156 = vector.shape_cast %139 : vector<8x1xf32> to vector<1x8x1xf32>
    tpu.vector_store %arg14[%c3_84, %c0_85, %c0_86], %156 {strides = array<i32>} : memref<4x8x1xf32, #tpu.memory_space<vmem>>, vector<1x8x1xf32>,
    %157 = arith.truncf %144 : vector<8x8xf32> to vector<8x8xbf16>
    %cst_87 = arith.constant dense<0.000000e+00> : vector<8x8xf32>
    %158 = tpu.matmul %157, %129, %cst_87 {dimension_numbers = #tpu.dot_dimension_numbers<[1], [0], [0], [1], [0, 0, 1, 1], [], []>} : vector<8x8xbf16>, vector<8x8xbf16>, vector<8x8xf32> -> vector<8x8xf32>
    %c0_88 = arith.constant 0 : index
    %c24 = arith.constant 24 : index
    %159 = vector.load %arg16[%c0_88, %c24] : memref<8x32xf32, #tpu.memory_space<vmem>>, vector<8x8xf32>
    %160 = vector.broadcast %141 : vector<8x1xf32> to vector<8x8xf32>
    %161 = arith.mulf %160, %159 : vector<8x8xf32>
    %162 = arith.addf %161, %158 : vector<8x8xf32>
    %c0_89 = arith.constant 0 : index
    %c24_90 = arith.constant 24 : index
    %163 = vector.load %arg16[%c0_89, %c24_90] : memref<8x32xf32, #tpu.memory_space<vmem>>, vector<8x8xf32>
    tpu.vector_store %arg16[%c0_89, %c24_90], %162 {strides = array<i32>} : memref<8x32xf32, #tpu.memory_space<vmem>>, vector<8x8xf32>,
    %c0_i32_91 = arith.constant 0 : i32
    %164 = arith.cmpi eq, %arg2, %c0_i32_91 : i32
    %165 = arith.extui %164 : i1 to i32
    %c0_i32_92 = arith.constant 0 : i32
    %166 = arith.cmpi ne, %165, %c0_i32_92 : i32
    scf.if %166 {
      %c0_93 = arith.constant 0 : index
      %c0_94 = arith.constant 0 : index
      %c0_95 = arith.constant 0 : index
      %167 = vector.load %arg15[%c0_93, %c0_94, %c0_95] : memref<4x8x1xf32, #tpu.memory_space<vmem>>, vector<1x8x1xf32>
      %168 = vector.shape_cast %167 : vector<1x8x1xf32> to vector<8x1xf32>
      %169 = tpu.reciprocal %168 {approx = true} : vector<8x1xf32> -> vector<8x1xf32>
      %c0_96 = arith.constant 0 : index
      %c0_97 = arith.constant 0 : index
      %170 = vector.load %arg16[%c0_96, %c0_97] : memref<8x32xf32, #tpu.memory_space<vmem>>, vector<8x8xf32>
      %171 = vector.broadcast %169 : vector<8x1xf32> to vector<8x8xf32>
      %172 = arith.mulf %170, %171 : vector<8x8xf32>
      %c0_98 = arith.constant 0 : index
      %c0_99 = arith.constant 0 : index
      %173 = vector.load %arg16[%c0_98, %c0_99] : memref<8x32xf32, #tpu.memory_space<vmem>>, vector<8x8xf32>
      tpu.vector_store %arg16[%c0_98, %c0_99], %172 {strides = array<i32>} : memref<8x32xf32, #tpu.memory_space<vmem>>, vector<8x8xf32>,
      %c1_100 = arith.constant 1 : index
      %c0_101 = arith.constant 0 : index
      %c0_102 = arith.constant 0 : index
      %174 = vector.load %arg15[%c1_100, %c0_101, %c0_102] : memref<4x8x1xf32, #tpu.memory_space<vmem>>, vector<1x8x1xf32>
      %175 = vector.shape_cast %174 : vector<1x8x1xf32> to vector<8x1xf32>
      %176 = tpu.reciprocal %175 {approx = true} : vector<8x1xf32> -> vector<8x1xf32>
      %c0_103 = arith.constant 0 : index
      %c8_104 = arith.constant 8 : index
      %177 = vector.load %arg16[%c0_103, %c8_104] : memref<8x32xf32, #tpu.memory_space<vmem>>, vector<8x8xf32>
      %178 = vector.broadcast %176 : vector<8x1xf32> to vector<8x8xf32>
      %179 = arith.mulf %177, %178 : vector<8x8xf32>
      %c0_105 = arith.constant 0 : index
      %c8_106 = arith.constant 8 : index
      %180 = vector.load %arg16[%c0_105, %c8_106] : memref<8x32xf32, #tpu.memory_space<vmem>>, vector<8x8xf32>
      tpu.vector_store %arg16[%c0_105, %c8_106], %179 {strides = array<i32>} : memref<8x32xf32, #tpu.memory_space<vmem>>, vector<8x8xf32>,
      %c2_107 = arith.constant 2 : index
      %c0_108 = arith.constant 0 : index
      %c0_109 = arith.constant 0 : index
      %181 = vector.load %arg15[%c2_107, %c0_108, %c0_109] : memref<4x8x1xf32, #tpu.memory_space<vmem>>, vector<1x8x1xf32>
      %182 = vector.shape_cast %181 : vector<1x8x1xf32> to vector<8x1xf32>
      %183 = tpu.reciprocal %182 {approx = true} : vector<8x1xf32> -> vector<8x1xf32>
      %c0_110 = arith.constant 0 : index
      %c16_111 = arith.constant 16 : index
      %184 = vector.load %arg16[%c0_110, %c16_111] : memref<8x32xf32, #tpu.memory_space<vmem>>, vector<8x8xf32>
      %185 = vector.broadcast %183 : vector<8x1xf32> to vector<8x8xf32>
      %186 = arith.mulf %184, %185 : vector<8x8xf32>
      %c0_112 = arith.constant 0 : index
      %c16_113 = arith.constant 16 : index
      %187 = vector.load %arg16[%c0_112, %c16_113] : memref<8x32xf32, #tpu.memory_space<vmem>>, vector<8x8xf32>
      tpu.vector_store %arg16[%c0_112, %c16_113], %186 {strides = array<i32>} : memref<8x32xf32, #tpu.memory_space<vmem>>, vector<8x8xf32>,
      %c3_114 = arith.constant 3 : index
      %c0_115 = arith.constant 0 : index
      %c0_116 = arith.constant 0 : index
      %188 = vector.load %arg15[%c3_114, %c0_115, %c0_116] : memref<4x8x1xf32, #tpu.memory_space<vmem>>, vector<1x8x1xf32>
      %189 = vector.shape_cast %188 : vector<1x8x1xf32> to vector<8x1xf32>
      %190 = tpu.reciprocal %189 {approx = true} : vector<8x1xf32> -> vector<8x1xf32>
      %c0_117 = arith.constant 0 : index
      %c24_118 = arith.constant 24 : index
      %191 = vector.load %arg16[%c0_117, %c24_118] : memref<8x32xf32, #tpu.memory_space<vmem>>, vector<8x8xf32>
      %192 = vector.broadcast %190 : vector<8x1xf32> to vector<8x8xf32>
      %193 = arith.mulf %191, %192 : vector<8x8xf32>
      %c0_119 = arith.constant 0 : index
      %c24_120 = arith.constant 24 : index
      %194 = vector.load %arg16[%c0_119, %c24_120] : memref<8x32xf32, #tpu.memory_space<vmem>>, vector<8x8xf32>
      tpu.vector_store %arg16[%c0_119, %c24_120], %193 {strides = array<i32>} : memref<8x32xf32, #tpu.memory_space<vmem>>, vector<8x8xf32>,
      %c0_121 = arith.constant 0 : index
      %c0_122 = arith.constant 0 : index
      %195 = vector.load %arg16[%c0_121, %c0_122] : memref<8x32xf32, #tpu.memory_space<vmem>>, vector<8x32xf32>
      %196 = arith.truncf %195 : vector<8x32xf32> to vector<8x32xbf16>
      %c0_123 = arith.constant 0 : index
      %c0_124 = arith.constant 0 : index
      %197 = vector.load %arg10[%c0_123, %c0_124] : memref<32x32xbf16, #tpu.memory_space<vmem>>, vector<32x32xbf16>
      %cst_125 = arith.constant dense<0.000000e+00> : vector<8x32xf32>
      %198 = tpu.matmul %196, %197, %cst_125 {dimension_numbers = #tpu.dot_dimension_numbers<[1], [0], [0], [1], [0, 0, 1, 1], [], []>} : vector<8x32xbf16>, vector<32x32xbf16>, vector<8x32xf32> -> vector<8x32xf32>
      %c0_126 = arith.constant 0 : index
      %c0_127 = arith.constant 0 : index
      %199 = vector.load %arg11[%c0_126, %c0_127] : memref<1x32xf32, #tpu.memory_space<vmem>>, vector<1x32xf32>
      %200 = vector.broadcast %199 : vector<1x32xf32> to vector<8x32xf32>
      %201 = arith.addf %198, %200 : vector<8x32xf32>
      %c0_128 = arith.constant 0 : index
      %c0_129 = arith.constant 0 : index
      %c0_130 = arith.constant 0 : index
      %202 = vector.load %arg12[%c0_128, %c0_129, %c0_130] : memref<1x8x32xf32, #tpu.memory_space<vmem>>, vector<1x8x32xf32>
      %203 = vector.shape_cast %202 : vector<1x8x32xf32> to vector<8x32xf32>
      %204 = vector.shape_cast %201 : vector<8x32xf32> to vector<1x8x32xf32>
      tpu.vector_store %arg12[%c0_128, %c0_129, %c0_130], %204 {strides = array<i32>} : memref<1x8x32xf32, #tpu.memory_space<vmem>>, vector<1x8x32xf32>,
    } else {
    }
    return
  }
  func.func @transform_0(%arg0: i32, %arg1: i32, %arg2: i32) -> (i32, i32, i32) {
    %c0_i32 = arith.constant 0 : i32
    %c0_i32_0 = arith.constant 0 : i32
    return %arg0, %arg1, %c0_i32 : i32, i32, i32
  }
  func.func @transform_1(%arg0: i32, %arg1: i32, %arg2: i32) -> (i32, i32, i32) {
    %c0_i32 = arith.constant 0 : i32
    %c0_i32_0 = arith.constant 0 : i32
    return %arg0, %arg2, %c0_i32 : i32, i32, i32
  }
  func.func @transform_2(%arg0: i32, %arg1: i32, %arg2: i32) -> (i32, i32, i32) {
    %c0_i32 = arith.constant 0 : i32
    %c0_i32_0 = arith.constant 0 : i32
    return %arg0, %arg2, %c0_i32 : i32, i32, i32
  }
  func.func @transform_3(%arg0: i32, %arg1: i32, %arg2: i32) -> (i32, i32, i32, i32) {
    %c0_i32 = arith.constant 0 : i32
    %c0_i32_0 = arith.constant 0 : i32
    return %arg0, %c0_i32, %arg1, %arg2 : i32, i32, i32, i32
  }
  func.func @transform_4(%arg0: i32, %arg1: i32, %arg2: i32) -> (i32, i32) {
    %c0_i32 = arith.constant 0 : i32
    %c0_i32_0 = arith.constant 0 : i32
    %c0_i32_1 = arith.constant 0 : i32
    return %c0_i32, %c0_i32_0 : i32, i32
  }
  func.func @transform_5(%arg0: i32, %arg1: i32, %arg2: i32) -> (i32, i32) {
    %c0_i32 = arith.constant 0 : i32
    %c0_i32_0 = arith.constant 0 : i32
    %c0_i32_1 = arith.constant 0 : i32
    return %c0_i32, %c0_i32_0 : i32, i32
  }
  func.func @transform_6(%arg0: i32, %arg1: i32, %arg2: i32) -> (i32, i32) {
    %c0_i32 = arith.constant 0 : i32
    %c0_i32_0 = arith.constant 0 : i32
    %c0_i32_1 = arith.constant 0 : i32
    return %c0_i32, %c0_i32_0 : i32, i32
  }
  func.func @transform_7(%arg0: i32, %arg1: i32, %arg2: i32) -> (i32, i32) {
    %c0_i32 = arith.constant 0 : i32
    %c0_i32_0 = arith.constant 0 : i32
    %c0_i32_1 = arith.constant 0 : i32
    return %c0_i32, %c0_i32_0 : i32, i32
  }
  func.func @transform_8(%arg0: i32, %arg1: i32, %arg2: i32) -> (i32, i32) {
    %c0_i32 = arith.constant 0 : i32
    %c0_i32_0 = arith.constant 0 : i32
    %c0_i32_1 = arith.constant 0 : i32
    return %c0_i32, %c0_i32_0 : i32, i32
  }
  func.func @transform_9(%arg0: i32, %arg1: i32, %arg2: i32) -> (i32, i32, i32) {
    %c0_i32 = arith.constant 0 : i32
    %c0_i32_0 = arith.constant 0 : i32
    return %arg0, %arg1, %c0_i32 : i32, i32, i32
  }
}

</mosaic_0001>

<bundles_post_ra>
// kernel: tpu_custom_call.1
= control target key start
LH: loop header
LB: loop body
LE: loop exit
PB: predicated region body
PF: predicated region fallthrough
CT: control target
= control target key end

     0   :  { %s2881_s0 = inlined_call_operand.hbm [shape: bf16[2,8,32], index: 0, kind: input, shape index: {}]   ;;  %s2882_s1 = inlined_call_operand.hbm [shape: bf16[2,8,32], index: 1, kind: input, shape index: {}]   ;;  %s2883_s2 = inlined_call_operand.hbm [shape: bf16[2,8,32], index: 2, kind: input, shape index: {}]   ;;  %s2884_s3 = inlined_call_operand.hbm [shape: bf16[2,4,8,8], index: 3, kind: input, shape index: {}]   ;;  %s2885_s4 = inlined_call_operand.hbm [shape: bf16[32,32], index: 4, kind: input, shape index: {}]   ;;  %s2886_s5 = inlined_call_operand.vmem [shape: bf16[32,32], index: 5, kind: input, shape index: {}]   ;;  %s2887_s6 = inlined_call_operand.hbm [shape: bf16[32,32], index: 6, kind: input, shape index: {}]   ;;  %s2888_s7 = inlined_call_operand.hbm [shape: bf16[32,32], index: 7, kind: input, shape index: {}]   ;;  %s2889_s8 = inlined_call_operand.vmem [shape: f32[1,32], index: 8, kind: input, shape index: {}]   ;;  %s2890_s9 = inlined_call_operand.hbm [shape: f32[2,8,32], index: 9, kind: output, shape index: {}]  }
   0x1   :  { %2913 = sst [smem:[#allocation32_spill]] %s2882_s1 }
   0x2   :  { %2914 = sst [smem:[#allocation33_spill]] %s2885_s4 }
   0x3   :  { %2915 = sst [smem:[#allocation34_spill]] %s2886_s5 }
   0x4   :  { %2916 = sst [smem:[#allocation35_spill]] %s2887_s6 }
   0x5   :  { %2917 = sst [smem:[#allocation36_spill]] %s2888_s7 }
   0x6   :  { %2918 = sst [smem:[#allocation37_spill]] %s2889_s8 }
   0x7   :  { %2919 = sst [smem:[#allocation38_spill]] %s2890_s9 }
   0x8   :  { %14 = vsyncpa [#allocation7], 0 }
   0x9   :  { %16 = vsyncpa [#allocation7 + $0x1], 0 }
   0xa   :  { %17 = vsyncpa [#allocation10], 0 }
   0xb   :  { %19 = vsyncpa [#allocation10 + $0x1], 0 }
   0xc   :  { %20 = vsyncpa [#allocation13], 0 }
   0xd   :  { %22 = vsyncpa [#allocation13 + $0x1], 0 }
   0xe   :  { %23 = vsyncpa [#allocation16], 0 }
   0xf   :  { %24 = vsyncpa [#allocation8], 0 }
  0x10   :  { %26 = vsyncpa [#allocation8 + $0x1], 0  ;;  %s2311_s30 = smov 0   ;;  %s2313_s10 = smov 0  }
  0x11   :  { %s2315_s11 = smov 0   ;;  %s2317_s12 = smov 0  }
  0x12   :  { %s2319_s13 = smov 0   ;;  %s2321_s14 = smov 0  }
  0x13 LB: > { %2920 = sst [smem:[#allocation25_spill]] %s2219_s30  ;;  %s2342_s15 = sadd.s32 4294967295, %s2239_s14   ;;  %s2239_s14 = sphi %s2321_s14, %s32_s14   ;;  %s2235_s13 = sphi %s2319_s13, %s2970_s13   ;;  %s2231_s12 = sphi %s2317_s12, %s2969_s12   ;;  %s2227_s11 = sphi %s2315_s11, %s2965_s11   ;;  %s2223_s10 = sphi %s2313_s10, %s2968_s10   ;;  %s2219_s30 = sphi %s2311_s30, %s2967_s30  }
  0x14   : > { %2921 = sst [smem:[#allocation26_spill]] %s2227_s11  ;;  %s1614_s16 = sadd.s32 4294967294, %s2239_s14  }
  0x15   : > { %2922 = sst [smem:[#allocation27_spill]] %s2231_s12  ;;  %p73_p0 = scmp.ne.s32.totalorder %s2223_s10, %s2219_s30 }
  0x16   : > { %p2891_p1 = scmp.eq.s32.totalorder %s2342_s15, 0  ;;  %p296_p3 = scmp.eq.s32.totalorder %s1614_s16, 1 }
  0x17   : > { %p1615_p5 = scmp.ge.s32.totalorder %s2239_s14, 1  ;;  %p303_p7 = scmp.lt.s32.totalorder %s2239_s14, 3 }
  0x18   : > { %p2351_p4 = por %p2891_p1, %p73_p0  ;;  %p2356_p6 = por %p296_p3, %p73_p0 }
  0x19   : > { %p2361_p8 = pnand %p1615_p5, %p303_p7  ;;  %s2241_s20 = smov [#allocation14]  }
  0x1a   : > { %s2923_s17 = scalar_select %p2351_p4, 1, 0 }
  0x1b   : > { %s2924_s18 = scalar_select %p2356_p6, 1, 0 }
  0x1c   : > { %s2926_s19 = scalar_select %p2361_p8, 1, 0 }
  0x1d   : > { %2925 = sst [smem:[#allocation28_spill]] %s2924_s18  ;;  %s315_s21 = sshll.u32 %s2241_s20, 4  ;;  %s2365_s21 = int_to_ptr.vmem [resolvable:$true] %s315_s21 }
  0x1e   : > { %p1804_p9 = pneg %p2361_p8  ;;  %s2242_s23 = smov [#allocation15]  }
  0x1f   : > { %s331_s24 = sshll.u32 %s2242_s23, 4  ;;  %s2928_s4 = sld [smem:[#allocation33_spill]]  ;;  %s2376_s24 = int_to_ptr.vmem [resolvable:$true] %s331_s24 }
  0x20   : > { %p2372_p11 = pnand %p1804_p9, %p2891_p1 }
  0x22   : > { %s2927_s22 = scalar_select %p2372_p11, 1, 0 }
  0x23   : > { %p2386_p13 = pneg %p2372_p11 }
  0x25   : > { %s1937_s27 = scalar_lea.hbm %s2928_s4, 256 }
  0x26   : > { %p1938_p12 = scmp.ne.s32.totalorder %s2928_s4, %s1937_s27  ;;  %p1944_p5 = scmp.lt.u32.totalorder %s1937_s27, %s2928_s4 }
  0x27   : > { %s2929_s16 = scalar_select %p2386_p13, 1, 0 }
  0x28   : > { %p1940_p0 = pnand %p2386_p13, %p1938_p12 }
  0x2a   : > { %p1941_p3 = pneg %p1940_p0 }
  0x2c   : > { %p1946_p7 = pnand %p1944_p5, %p1941_p3 }
  0x2e   : > { %1949 = shalt.err (!%p1946_p7)
}
  0x2f   : > { %s1950_s25 = scalar_lea.vmem %s2365_s21, 256  ;;  %p1958_p2 = scmp.lt.s32.totalorder %s2365_s21, %s2365_s21 }
  0x30   : > { %p1951_p9 = scmp.ne.s32.totalorder %s2365_s21, %s1950_s25  ;;  %p1959_p6 = scmp.lt.s32.totalorder %s1950_s25, %s1950_s25 }
  0x32   : > { %p1953_p10 = pnand %p1951_p9, %p2386_p13  ;;  %p1960_p12 = por %p1959_p6, %p1958_p2 }
  0x34   : > { %p1954_p1 = pneg %p1953_p10 }
  0x36   : > { %p1961_p0 = pnand %p1960_p12, %p1954_p1 }
  0x38   : > { %1964 = shalt.err (!%p1961_p0)
}
  0x39   : > { %s2895_s26 = smov 64   ;;  %s2897_s27 = smov 4  }
  0x3a   : > { %1807 = dma.hbm_to_vmem [thread:$0]  (!%p2372_p11), %s2928_s4, 256, %s2365_s21, [#allocation13], %s2895_s26, %s2895_s26, %s2897_s27  }
  0x3b   : > { %s2930_s6 = sld [smem:[#allocation35_spill]] }
  0x41   : > { %s1965_s25 = scalar_lea.hbm %s2930_s6, 256 }
  0x42   : > { %p1966_p1 = scmp.ne.s32.totalorder %s2930_s6, %s1965_s25  ;;  %p1972_p10 = scmp.lt.u32.totalorder %s1965_s25, %s2930_s6 }
  0x44   : > { %p1968_p2 = pnand %p1966_p1, %p2386_p13 }
  0x46   : > { %p1969_p6 = pneg %p1968_p2 }
  0x48   : > { %p1974_p3 = pnand %p1972_p10, %p1969_p6 }
  0x4a   : > { %1977 = shalt.err (!%p1974_p3)
}
  0x4b   : > { %s1978_s21 = scalar_lea.vmem %s2376_s24, 256  ;;  %p1986_p12 = scmp.lt.s32.totalorder %s2376_s24, %s2376_s24 }
  0x4c   : > { %p1979_p5 = scmp.ne.s32.totalorder %s2376_s24, %s1978_s21  ;;  %p1987_p0 = scmp.lt.s32.totalorder %s1978_s21, %s1978_s21 }
  0x4e   : > { %p1981_p7 = pnand %p1979_p5, %p2386_p13  ;;  %p1988_p1 = por %p1987_p0, %p1986_p12 }
  0x50   : > { %p1982_p9 = pneg %p1981_p7 }
  0x52   : > { %p1989_p2 = pnand %p1988_p1, %p1982_p9 }
  0x54   : > { %1992 = shalt.err (!%p1989_p2)
}
  0x55   : > { %1810 = dma.hbm_to_vmem [thread:$0]  (!%p2372_p11), %s2930_s6, 256, %s2376_s24, [#allocation16], %s2895_s26, %s2895_s26, %s2897_s27  }
  0x56   : > { %s51_s30 = sadd.s32 1, %s2235_s13  ;;  %s60_s18 = sadd.s32 1, %s2227_s11 }
  0x57   : > { %p53_p6 = scmp.ge.s32.totalorder %s51_s30, 2  ;;  %p67_p10 = scmp.ne.s32.totalorder %s2227_s11, %s2223_s10 }
  0x58   : > { %p68_p3 = scmp.eq.s32.totalorder %s2239_s14, 0  ;;  %p1834_p5 = scmp.lt.s32.totalorder %s2239_s14, 2 }
  0x59   : > { %s2972_s30 = smov (%p53_p6, %s51_s30), 0  ;;  %p2932_p9 = scmp.eq.s32.totalorder %s2342_s15, 1 }
  0x5a   : > { %2931 = sst [smem:[#allocation29_spill]] %s2972_s30  ;;  %p69_p7 = por %p68_p3, %p67_p10 }
  0x5b   : > { %p2446_p12 = por %p2932_p9, %p67_p10  ;;  %s55_s29 = ssub.s32 %s2235_s13, %s2972_s30 }
  0x5c   : > { %s2453_s24 = sand.u32 1, %s2227_s11   ;;  %p58_p0 = scmp.eq.s32.totalorder %s55_s29, 0 }
  0x5d   : > { %s2933_s28 = scalar_select %p2446_p12, 1, 0 }
  0x5e   : > { %s2456_s20 = sshll.u32 %s2453_s24, 2  ;;  %s2459_s23 = sshll.u32 %s2235_s13, 6 }
  0x5f   : > { %2934 = sst [smem:[#allocation30_spill]] %s2933_s28  ;;  %p2461_p1 = pnand %p1834_p5, %p69_p7 }
  0x60   : > { %s2466_s21 = scalar_select %p58_p0, %s2227_s11, %s60_s18  }
  0x61   : > { %s2935_s25 = scalar_select %p2461_p1, 1, 0 }
  0x62   : > { %2936 = sst [smem:[#allocation31_spill]] %s2466_s21  ;;  %s2903_s8 = sand.u32 1, %s2239_s14  }
  0x63   : > { %s2937_s1 = sld [smem:[#allocation32_spill]]  ;;  %s384_s29 = scalar_lea.vmem [#allocation9], %s2456_s20 }
  0x64   : > { %s392_s4 = sshll.u32 %s384_s29, 4  ;;  %s2480_s6 = scalar_lea.sflag [#allocation10], %s2903_s8  ;;  %s2476_s4 = int_to_ptr.vmem [resolvable:$true] %s392_s4 }
  0x65   : > { %p2486_p6 = pneg %p2461_p1 }
  0x69   : > { %s2473_s27 = scalar_lea.hbm %s2937_s1, %s2459_s23  ;;  %s1998_s29 = scalar_lea.hbm %s2937_s1, 128 }
  0x6a   : > { %s1993_s30 = scalar_lea.hbm %s2473_s27, 64  ;;  %p1999_p5 = scmp.lt.u32.totalorder %s2473_s27, %s2937_s1 }
  0x6b   : > { %p1994_p2 = scmp.ne.s32.totalorder %s2473_s27, %s1993_s30  ;;  %p2000_p7 = scmp.lt.u32.totalorder %s1998_s29, %s1993_s30 }
  0x6c   : > { %p2002_p0 = scmp.lt.u32.totalorder %s1993_s30, %s2473_s27 }
  0x6d   : > { %p1996_p10 = pnand %p2486_p6, %p1994_p2  ;;  %p2001_p9 = por %p2000_p7, %p1999_p5 }
  0x6f   : > { %p1997_p3 = pneg %p1996_p10  ;;  %p2003_p12 = por %p2002_p0, %p2001_p9 }
  0x71   : > { %p2004_p4 = pnand %p2003_p12, %p1997_p3 }
  0x73   : > { %2007 = shalt.err (!%p2004_p4)
}
  0x74   : > { %s2008_s8 = scalar_lea.vmem %s2476_s4, 64  ;;  %s2245_s26 = smov [#allocation9]  }
  0x75   : > { %p2009_p2 = scmp.ne.s32.totalorder %s2476_s4, %s2008_s8  ;;  %s2013_s9 = sshll.u32 %s2245_s26, 4  ;;  %s2014_s9 = int_to_ptr.vmem [resolvable:$false] %s2013_s9 }
  0x76   : > { %s2015_s11 = scalar_lea.vmem %s2014_s9, 128  ;;  %p2016_p11 = scmp.lt.s32.totalorder %s2476_s4, %s2014_s9 }
  0x77   : > { %p2011_p10 = pnand %p2009_p2, %p2486_p6  ;;  %p2017_p13 = scmp.lt.s32.totalorder %s2015_s11, %s2008_s8 }
  0x79   : > { %p2012_p8 = pneg %p2011_p10  ;;  %p2018_p5 = por %p2017_p13, %p2016_p11 }
  0x7b   : > { %p2019_p7 = pnand %p2018_p5, %p2012_p8 }
  0x7d   : > { %2022 = shalt.err (!%p2019_p7)
}
  0x7e   : > { %1820 = dma.hbm_to_vmem [thread:$0]  (!%p2461_p1), %s2473_s27, 64, %s2476_s4, %s2480_s6  }
  0x7f   : > { %s1626_s30 = sshll.u32 %s2453_s24, 4  ;;  %s2246_s21 = smov [#allocation17]  }
  0x80   : > { %s344_s29 = sshll.u32 %s2246_s21, 4  ;;  %s422_s1 = scalar_lea.vmem [#allocation12], %s1626_s30  ;;  %s345_s29 = int_to_ptr.vmem [resolvable:$true] %s344_s29 }
  0x81   : > { %s431_s26 = sshll.u32 %s422_s1, 4  ;;  %s2939_s7 = sld [smem:[#allocation36_spill]]  ;;  %s2511_s26 = int_to_ptr.vmem [resolvable:$true] %s431_s26 }
  0x82   : > { %p2940_p8 = scmp.ne.s32.totalorder %s2929_s16, 0 }
  0x87   : > { %s2023_s11 = scalar_lea.hbm %s2939_s7, 256 }
  0x88   : > { %p2024_p4 = scmp.ne.s32.totalorder %s2939_s7, %s2023_s11  ;;  %p2030_p12 = scmp.lt.u32.totalorder %s2023_s11, %s2939_s7 }
  0x8a   : > { %p2026_p11 = pnand %p2024_p4, %p2940_p8 }
  0x8c   : > { %p2027_p13 = pneg %p2026_p11 }
  0x8e   : > { %p2032_p3 = pnand %p2030_p12, %p2027_p13 }
  0x90   : > { %2035 = shalt.err (!%p2032_p3)
}
  0x91   : > { %s2036_s1 = scalar_lea.vmem %s345_s29, 256  ;;  %p2044_p10 = scmp.lt.s32.totalorder %s345_s29, %s345_s29 }
  0x92   : > { %p2037_p9 = scmp.ne.s32.totalorder %s345_s29, %s2036_s1  ;;  %p2045_p5 = scmp.lt.s32.totalorder %s2036_s1, %s2036_s1 }
  0x94   : > { %p2039_p0 = pnand %p2037_p9, %p2940_p8  ;;  %p2046_p7 = por %p2045_p5, %p2044_p10 }
  0x96   : > { %p2040_p2 = pneg %p2039_p0 }
  0x98   : > { %p2047_p1 = pnand %p2046_p7, %p2040_p2 }
  0x9a   : > { %2050 = shalt.err (!%p2047_p1)
}
  0x9b   : > { %p2941_p4 = scmp.ne.s32.totalorder %s2927_s22, 0  ;;  %s2942_s12 = smov 4  }
  0x9c   : > { %s2943_s28 = smov 64   ;;  %s2538_s9 = scalar_lea.hbm %s2881_s0, %s2459_s23 }
  0x9d   : > { %1813 = dma.hbm_to_vmem [thread:$0]  (!%p2941_p4), %s2939_s7, 256, %s345_s29, [#allocation16], %s2943_s28, %s2943_s28, %s2942_s12  }
  0x9e   : > { %s365_s22 = scalar_lea.vmem [#allocation6], %s2456_s20  ;;  %s2547_s1 = scalar_lea.hbm %s2883_s2, %s2459_s23 }
  0x9f   : > { %s373_s11 = sshll.u32 %s365_s22, 4  ;;  %s362_s30 = scalar_lea.sflag [#allocation7], %s2453_s24  ;;  %s2541_s11 = int_to_ptr.vmem [resolvable:$true] %s373_s11 }
  0xa0   : > { %s2051_s29 = scalar_lea.hbm %s2538_s9, 64  ;;  %s2056_s8 = scalar_lea.hbm %s2881_s0, 128 }
  0xa1   : > { %p2052_p1 = scmp.ne.s32.totalorder %s2538_s9, %s2051_s29  ;;  %p2057_p13 = scmp.lt.u32.totalorder %s2538_s9, %s2881_s0 }
  0xa2   : > { %p2058_p12 = scmp.lt.u32.totalorder %s2056_s8, %s2051_s29  ;;  %p2060_p9 = scmp.lt.u32.totalorder %s2051_s29, %s2538_s9 }
  0xa3   : > { %p2054_p8 = pnand %p2052_p1, %p2486_p6 }
  0xa4   : > { %p2059_p3 = por %p2058_p12, %p2057_p13 }
  0xa5   : > { %p2055_p11 = pneg %p2054_p8 }
  0xa6   : > { %p2061_p0 = por %p2060_p9, %p2059_p3 }
  0xa8   : > { %p2062_p2 = pnand %p2061_p0, %p2055_p11 }
  0xaa   : > { %2065 = shalt.err (!%p2062_p2)
}
  0xab   : > { %s2066_s24 = scalar_lea.vmem %s2541_s11, 64  ;;  %s2247_s23 = smov [#allocation6]  }
  0xac   : > { %p2067_p10 = scmp.ne.s32.totalorder %s2541_s11, %s2066_s24  ;;  %s2071_s22 = sshll.u32 %s2247_s23, 4  ;;  %s2072_s22 = int_to_ptr.vmem [resolvable:$false] %s2071_s22 }
  0xad   : > { %s2073_s5 = scalar_lea.vmem %s2072_s22, 128  ;;  %p2074_p4 = scmp.lt.s32.totalorder %s2541_s11, %s2072_s22 }
  0xae   : > { %p2069_p5 = pnand %p2067_p10, %p2486_p6  ;;  %p2075_p1 = scmp.lt.s32.totalorder %s2073_s5, %s2066_s24 }
  0xb0   : > { %p2070_p7 = pneg %p2069_p5  ;;  %p2076_p8 = por %p2075_p1, %p2074_p4 }
  0xb2   : > { %p2077_p13 = pnand %p2076_p8, %p2070_p7 }
  0xb4   : > { %2080 = shalt.err (!%p2077_p13)
}
  0xb5   : > { %p2944_p11 = scmp.ne.s32.totalorder %s2935_s25, 0  ;;  %s403_s7 = scalar_lea.vmem [#allocation11], %s2456_s20 }
  0xb6   : > { %s411_s4 = sshll.u32 %s403_s7, 4  ;;  %s1664_s27 = sshll.u32 %s2235_s13, 8  ;;  %s412_s4 = int_to_ptr.vmem [resolvable:$true] %s411_s4 }
  0xb7   : > { %1817 = dma.hbm_to_vmem [thread:$0]  (!%p2944_p11), %s2538_s9, 64, %s2541_s11, %s362_s30  }
  0xb8   : > { %s2576_s16 = scalar_lea.hbm %s2884_s3, %s1664_s27  ;;  %s2081_s8 = scalar_lea.hbm %s2547_s1, 64 }
  0xb9   : > { %p2082_p12 = scmp.ne.s32.totalorder %s2547_s1, %s2081_s8  ;;  %s2086_s22 = scalar_lea.hbm %s2883_s2, 128 }
  0xba   : > { %p2087_p0 = scmp.lt.u32.totalorder %s2547_s1, %s2883_s2  ;;  %p2088_p2 = scmp.lt.u32.totalorder %s2086_s22, %s2081_s8 }
  0xbb   : > { %p2084_p3 = pnand %p2082_p12, %p2486_p6  ;;  %p2090_p5 = scmp.lt.u32.totalorder %s2081_s8, %s2547_s1 }
  0xbc   : > { %p2089_p10 = por %p2088_p2, %p2087_p0 }
  0xbd   : > { %p2085_p9 = pneg %p2084_p3 }
  0xbe   : > { %p2091_p7 = por %p2090_p5, %p2089_p10 }
  0xc0   : > { %p2092_p4 = pnand %p2091_p7, %p2085_p9 }
  0xc2   : > { %2095 = shalt.err (!%p2092_p4)
}
  0xc3   : > { %s2096_s20 = scalar_lea.vmem %s412_s4, 64  ;;  %s2248_s11 = smov [#allocation11]  }
  0xc4   : > { %p2097_p1 = scmp.ne.s32.totalorder %s412_s4, %s2096_s20  ;;  %s2101_s30 = sshll.u32 %s2248_s11, 4  ;;  %s2102_s30 = int_to_ptr.vmem [resolvable:$false] %s2101_s30 }
  0xc5   : > { %s2103_s7 = scalar_lea.vmem %s2102_s30, 128  ;;  %p2104_p12 = scmp.lt.s32.totalorder %s412_s4, %s2102_s30 }
  0xc6   : > { %p2099_p8 = pnand %p2097_p1, %p2486_p6  ;;  %p2105_p3 = scmp.lt.s32.totalorder %s2103_s7, %s2096_s20 }
  0xc8   : > { %p2100_p13 = pneg %p2099_p8  ;;  %p2106_p11 = por %p2105_p3, %p2104_p12 }
  0xca   : > { %p2107_p0 = pnand %p2106_p11, %p2100_p13 }
  0xcc   : > { %2110 = shalt.err (!%p2107_p0)
}
  0xcd   : > { %p2945_p2 = scmp.ne.s32.totalorder %s2935_s25, 0  ;;  %s2946_s27 = sand.u32 1, %s2239_s14  }
  0xce   : > { %s2598_s29 = scalar_lea.sflag [#allocation13], %s2946_s27  ;;  %s2111_s21 = scalar_lea.hbm %s2576_s16, 256 }
  0xcf   : > { %1823 = dma.hbm_to_vmem [thread:$0]  (!%p2945_p2), %s2547_s1, 64, %s412_s4, %s2480_s6  }
  0xd0   : > { %p2112_p9 = scmp.ne.s32.totalorder %s2576_s16, %s2111_s21  ;;  %s2116_s23 = scalar_lea.hbm %s2884_s3, 512 }
  0xd1   : > { %p2117_p5 = scmp.lt.u32.totalorder %s2576_s16, %s2884_s3  ;;  %p2118_p7 = scmp.lt.u32.totalorder %s2116_s23, %s2111_s21 }
  0xd2   : > { %p2114_p10 = pnand %p2112_p9, %p2486_p6  ;;  %p2120_p1 = scmp.lt.u32.totalorder %s2111_s21, %s2576_s16 }
  0xd3   : > { %p2119_p4 = por %p2118_p7, %p2117_p5 }
  0xd4   : > { %p2115_p11 = pneg %p2114_p10 }
  0xd5   : > { %p2121_p8 = por %p2120_p1, %p2119_p4 }
  0xd7   : > { %p2122_p13 = pnand %p2121_p8, %p2115_p11 }
  0xd9   : > { %2125 = shalt.err (!%p2122_p13)
}
  0xda   : > { %s2126_s6 = scalar_lea.vmem %s2511_s26, 256  ;;  %s2249_s1 = smov [#allocation12]  }
  0xdb   : > { %p2127_p12 = scmp.ne.s32.totalorder %s2511_s26, %s2126_s6  ;;  %s2131_s4 = sshll.u32 %s2249_s1, 4  ;;  %s2132_s4 = int_to_ptr.vmem [resolvable:$false] %s2131_s4 }
  0xdc   : > { %s2133_s9 = scalar_lea.vmem %s2132_s4, 512  ;;  %p2134_p9 = scmp.lt.s32.totalorder %s2511_s26, %s2132_s4 }
  0xdd   : > { %p2129_p3 = pnand %p2127_p12, %p2486_p6  ;;  %p2135_p10 = scmp.lt.s32.totalorder %s2133_s9, %s2126_s6 }
  0xdf   : > { %p2130_p0 = pneg %p2129_p3  ;;  %p2136_p5 = por %p2135_p10, %p2134_p9 }
  0xe1   : > { %p2137_p7 = pnand %p2136_p5, %p2130_p0 }
  0xe3   : > { %2140 = shalt.err (!%p2137_p7)
}
  0xe4   : > { %1826 = dma.hbm_to_vmem [thread:$0]  (!%p2945_p2), %s2576_s16, 256, %s2511_s26, %s2598_s29, %s2943_s28, %s2943_s28, %s2942_s12  }
  0xe5   : > { %p2947_p6 = scmp.ne.s32.totalorder %s2926_s19, 0 }
  0xe6   : > { %s2628_s18 = sand.u32 (!%p2947_p6), 1, %s2223_s10   ;;  %p2948_p11 = scmp.ne.s32.totalorder (!%p2947_p6), %s2923_s17, 0 }
  0xe7   : > { %443 = sbr.rel (%p2947_p6) target bundleno = 1737 (0x6c9), region = 56  ;;  %s2631_s20 = sshll.u32 (!%p2947_p6), %s2628_s18, 2 }
  0xe8   : > { %s446_s25 = scalar_lea.sflag (!%p2947_p6), [#allocation7], %s2628_s18  ;;  %s449_s11 = scalar_lea.vmem (!%p2947_p6), [#allocation6], %s2631_s20 }
  0xee   : > { %2194 = dma.done.wait (%p2948_p11), %s446_s25, 64  }
  0xef   : > { %2196 = vsyncadd (%p2948_p11), %s446_s25, 4294967232  ;;  %s454_s19 = sand.u32 1, %s2342_s15   ;;  %s458_s12 = scalar_lea.vmem [#allocation9], %s2631_s20 }
  0xf0   : > { %s455_s26 = scalar_lea.sflag [#allocation10], %s454_s19 }
  0xf1   : > { %2198 = dma.done.wait (%p2948_p11), %s455_s26, 128  }
  0xf2   : > { %2200 = vsyncadd (%p2948_p11), %s455_s26, 4294967168  ;;  %s1633_s28 = sshll.u32 %s2628_s18, 4  ;;  %s467_s16 = scalar_lea.vmem [#allocation11], %s2631_s20 }
  0xf3   : > { %s473_s30 = scalar_lea.sflag [#allocation13], %s454_s19  ;;  %s2647_s7 = scalar_lea.vmem [#allocation12], %s1633_s28 }
  0xf4   : > { %2202 = dma.done.wait (%p2948_p11), %s473_s30, 256  }
  0xf5   : > { %2204 = vsyncadd (%p2948_p11), %s473_s30, 4294967040  ;;  %p2949_p2 = scmp.eq.s32.totalorder %s2342_s15, 0 }
  0xf7   : > { %2206 = dma.done.wait (%p2949_p2), [#allocation13], 256   ;;  %p2950_p4 = pmov %p2949_p2 }
  0xf8   : > { %p2951_p1 = pmov %p2949_p2 }
  0xf9   : > { %2208 = vsyncadd (%p2950_p4), [#allocation13], 4294967040 }
  0xfa   : > { %2210 = dma.done.wait (%p2951_p1), [#allocation16], 512   ;;  %p2952_p8 = pmov %p2951_p1 }
  0xfb   : > { %vm560_vm0 = vcmask 261120   ;;  %v2250_v0 = vmov 0.0   ;;  %vm2251_vm1 = vmmov 0   ;;  %v1904_v1 = vld [vmem:[#allocation14] sm:$0xff]   ;;  %s2953_s27 = sld [smem:[#allocation34_spill]]  ;;  %v1906_v3 = vld [vmem:[#allocation14 + $0x8] sm:$0xff]  }
  0xfc   : > { %2212 = vsyncadd (%p2952_p8), [#allocation16], 4294966784  ;;  %1702 = vmatprep.subr.bf16.mxu0 %v2250_v0  ;;  %1710 = vmatprep.subr.bf16.mxu1 %v2250_v0  ;;  %616 = vst.msk [vmem:[#allocation5] sm:$0xff] %vm560_vm0, %v2250_v0  ;;  %v543_v5 = vld [vmem:[%s449_s11] sm:$0xf]  ;;  %vm605_vm2 = vcmask 257024  }
  0xfd   : > { %1706 = vmatprep.mubr.msk.bf16.mxu0 %vm2251_vm1, %v2250_v0  ;;  %1714 = vmatprep.mubr.msk.bf16.mxu1 %vm2251_vm1, %v2250_v0  ;;  %v617_v6 = vld [vmem:[%s458_s12] sm:$0xf]  ;;  %vm745_vm3 = vcmask 64512   ;;  %s2252_s8 = smov 120   ;;  %s2253_s24 = smov 112   ;;  %v1910_v21 = vld [vmem:[#allocation15 + $0x8] sm:$0xff]  }
  0xfe   : > { %1703 = vmatpush3.bf16.msra.mxu0 %v1904_v1  ;;  %s2254_s23 = smov 104   ;;  %v1909_v20 = vld [vmem:[#allocation15] sm:$0xff]   ;;  %v679_v22 = vld [vmem:[%s467_s16] sm:$0xf]  ;;  %vm607_vm4 = vcmask 7168   ;;  %v2255_v40 = vmov -inf  }
  0xff   : > { %1704 = vmatprep.subr.bf16.mxu0 %v2250_v0  ;;  %v1666_v32 = vld [vmem:[%s2647_s7] sm:$0xff]   ;;  %608 = vst.msk [vmem:[#allocation3] sm:$0xff] %vm607_vm4, %v2255_v40  ;;  %609 = vst.msk [vmem:[#allocation3 + $0x8] sm:$0xff] %vm607_vm4, %v2255_v40  ;;  %v2256_v41 = vmov 0   ;;  %v1673_v47 = vld [vmem:[%s2647_s7 + $0x8] sm:$0xff]   ;;  %vm823_vm5 = vcmask 1043456  }
 0x100   : > { %v1667_v33 = vunpack.c.l.bf16 %v1666_v32  ;;  %610 = vst.msk [vmem:[#allocation3 + $0x10] sm:$0xff] %vm607_vm4, %v2255_v40  ;;  %611 = vst.msk [vmem:[#allocation3 + $0x18] sm:$0xff] %vm607_vm4, %v2255_v40  ;;  %1902 = vset.pattern.permute.xlu1 %v2256_v41  ;;  %1903 = vset.pattern.permute.xlu0 %v2256_v41  ;;  %v1668_v42 = vunpack.c.h.bf16 %v1666_v32  ;;  %v1671_v50 = vunpack.c.l.bf16 %v1673_v47  ;;  %v1672_v57 = vunpack.c.h.bf16 %v1673_v47  ;;  %s2257_s22 = smov 8   ;;  %s2258_s5 = smov 16  }
 0x101   : > { %v1905_v2 = vld [vmem:[%s2953_s27] sm:$0xff]   ;;  %v1907_v4 = vld [vmem:[%s2953_s27 + $0x8] sm:$0xff]   ;;  %612 = vst.msk [vmem:[#allocation4] sm:$0xff] %vm607_vm4, %v2250_v0  ;;  %613 = vst.msk [vmem:[#allocation4 + $0x8] sm:$0xff] %vm607_vm4, %v2250_v0  ;;  %s2259_s6 = smov 24   ;;  %vm1020_vm6 = vcmask 130112  }
 0x102   : > { %1711 = vmatpush3.bf16.msra.mxu1 %v1905_v2  ;;  %1705 = vmatpush3.bf16.msra.mxu0 %v1906_v3  ;;  %614 = vst.msk [vmem:[#allocation4 + $0x10] sm:$0xff] %vm607_vm4, %v2250_v0  ;;  %615 = vst.msk [vmem:[#allocation4 + $0x18] sm:$0xff] %vm607_vm4, %v2250_v0  ;;  %vm1161_vm7 = vcmask 195712   ;;  %vm1302_vm8 = vcmask 261312   ;;  %s2954_s1 = sld [smem:[#allocation27_spill]]  ;;  %s1637_s4 = sshll.u32 %s2628_s18, 3 }
 0x103   : > { %1712 = vmatprep.subr.bf16.mxu1 %v2250_v0  ;;  %1718 = vmatprep.subr.bf16.mxu0 %v2250_v0  ;;  %s2955_s25 = sld [smem:[#allocation37_spill]]  ;;  %s537_s26 = scalar_lea.vmem [#allocation18], %s1637_s4 }
 0x104   : > { %s2956_s11 = sld [smem:[#allocation30_spill]]  ;;  %s1431_s12 = sshll.u32 %s537_s26, 4  ;;  %s2833_s12 = int_to_ptr.vmem [resolvable:$true] %s1431_s12 }
 0x105   : > { %1707 = vmatmul.mubr.msk.bf16.vlgmr.msra.gmra.mrb[0].mxu0 %vm560_vm0, %v543_v5  ;;  %s2957_s30 = sld [smem:[#allocation38_spill]]  ;;  %s1417_s17 = scalar_lea.sflag [#allocation8], %s2628_s18 }
 0x106   : > { %1713 = vmatpush3.bf16.msra.mxu1 %v1907_v4  ;;  %1722 = vmatprep.mubr.msk.bf16.mxu0 %vm2251_vm1, %v2250_v0  ;;  %v2752_v1 = vld [vmem:[#allocation3] sm:$0xff]  ;;  %s2141_s29 = scalar_lea.vmem %s2833_s12, 128  ;;  %s2260_s21 = smov [#allocation18]  }
 0x107   : > { %1726 = vmatprep.subr.bf16.mxu1 %v2250_v0  ;;  %1719 = vmatpush3.bf16.msra.mxu0 %v1909_v20  ;;  %v1216_v20 = vld [vmem:[#allocation3 + $0x18] sm:$0xff]  ;;  %p2142_p13 = scmp.ne.s32.totalorder %s2833_s12, %s2141_s29 }
 0x108   : > { %1720 = vmatprep.subr.bf16.mxu0 %v2250_v0  ;;  %s1661_s19 = sshll.u32 %s2954_s1, 7 }
 0x109   : > { %1715 = vmatmul.mubr.msk.bf16.vlgmr.msra.gmra.mrb[0].mxu1 %vm560_vm0, %v617_v6 }
 0x10a   : > { %1728 = vmatprep.mubr.msk.bf16.mxu1 %vm2251_vm1, %v2250_v0  ;;  %p2959_p12 = scmp.ne.s32.totalorder %s2956_s11, 0 }
 0x10b   : > { %1721 = vmatpush3.bf16.msra.mxu0 %v1910_v21  ;;  %s2958_s7 = smov %s2957_s30  ;;  %s2831_s15 = scalar_lea.hbm %s2957_s30, %s1661_s19 }
 0x10c   : > { %1732 = vmatprep.subr.bf16.mxu0 %v2250_v0  ;;  %p2143_p3 = pnand %p2142_p13, %p2959_p12 }
 0x10e   : > { %1723 = vmatmul.mubr.msk.bf16.vlgmr.msra.gmra.mrb[4].mxu0 %vm560_vm0, %v679_v22  ;;  %p2144_p0 = pneg %p2143_p3 }
 0x10f   : > { %1734 = vmatprep.mubr.msk.bf16.mxu0 %vm2251_vm1, %v2250_v0 }
 0x1d8   : > { %v598_v7 = vpop.f32.mrb[0].mxu0 }
 0x1d9   : > { %v604_v8 = vpack.c.bf16 %v598_v7, %v598_v7  ;;  %v1708_v10 = vpop.f32.mrb[1].mxu0 }
 0x1da   : > { %v601_v13 = vpop.f32.mrb[2].mxu0 }
 0x1db   : > { %606 = vst.msk [vmem:[#allocation2] sm:$0xf] %vm605_vm2, %v604_v8  ;;  %v1709_v15 = vpop.f32.mrb[3].mxu0 }
 0x1dc   : > { %v672_v9 = vpop.f32.mrb[0].mxu1  ;;  %v2774_v15 = vld [vmem:[#allocation3 + $0x10] sm:$0xff] }
 0x1dd   : > { %v678_v11 = vpack.c.bf16 %v672_v9, %v672_v9  ;;  %v1716_v12 = vpop.f32.mrb[1].mxu1 }
 0x1de   : > { %v675_v14 = vpop.f32.mrb[2].mxu1 }
 0x1df   : > { %v1717_v16 = vpop.f32.mrb[3].mxu1  ;;  %882 = vrot.lane.b32.xlu0 %v678_v11, %s2252_s8  ;;  %v750_v17 = vsel %vm745_vm3, %v678_v11, 0  ;;  %1024 = vrot.lane.b32.xlu1 %v678_v11, %s2253_s24 }
 0x1e0   : > { %1727 = vmatpush3.bf16.xpose.msra.mxu1 %v750_v17 }
 0x1e1   : > { %1738 = vmatprep.subr.bf16.mxu1 %v2250_v0  ;;  %v733_v4 = vpop.f32.mrb[4].mxu0 }
 0x1e2   : > { %v740_v18 = vld [vmem:[#allocation2] sm:$0xf]  ;;  %v1724_v5 = vpop.f32.mrb[5].mxu0  ;;  %v739_v9 = vpack.c.bf16 %v733_v4, %v733_v4 }
 0x1e3   : > { %v1649_v19 = vcombine.low %v740_v18, %v740_v18  ;;  %v736_v7 = vpop.f32.mrb[6].mxu0 }
 0x1e4   : > { %v1725_v8 = vpop.f32.mrb[7].mxu0  ;;  %v825_v10 = vsel %vm823_vm5, %v739_v9, 0 }
 0x1e5   : > { %1022 = vrot.lane.b32.xlu1 %v1649_v19, %s2253_s24  ;;  %879 = vrot.lane.b32.xlu0 %v1649_v19, %s2252_s8  ;;  %v950_v8 = vld [vmem:[#allocation4 + $0x8] sm:$0xff] }
 0x1e6   : > { %1733 = vmatpush3.bf16.msra.mxu0 %v825_v10 }
 0x1e7   : > { %1729 = vmatmul.mubr.msk.bf16.vlgmr.msra.gmra.mrb[4].mxu1 %vm745_vm3, %v740_v18  ;;  %1744 = vmatprep.subr.bf16.mxu0 %v2250_v0 }
 0x1e8   : > { %1740 = vmatprep.mubr.msk.bf16.mxu1 %vm2251_vm1, %v2250_v0 }
 0x1e9   : > { %1163 = vrot.lane.b32.xlu1 %v1649_v19, %s2254_s23  ;;  %1165 = vrot.lane.b32.xlu0 %v678_v11, %s2254_s23  ;;  %v2764_v11 = vld [vmem:[#allocation3 + $0x8] sm:$0xff] }
 0x251   : > { %v883_v23 = vpop.permute.xlu0 %882  ;;  %v1025_v25 = vpop.permute.xlu1 %1024 }
 0x252   : > { %v888_v24 = vsel %vm745_vm3, %v883_v23, 0  ;;  %v1030_v27 = vsel %vm745_vm3, %v1025_v25, 0 }
 0x253   : > { %1739 = vmatpush3.bf16.xpose.msra.mxu1 %v888_v24 }
 0x254   : > { %1750 = vmatprep.subr.bf16.mxu1 %v2250_v0 }
 0x257   : > { %v880_v26 = vpop.permute.xlu0 %879  ;;  %v1023_v29 = vpop.permute.xlu1 %1022 }
 0x25a   : > { %1741 = vmatmul.mubr.msk.bf16.vlgmr.msra.gmra.mrb[8].mxu1 %vm745_vm3, %v880_v26 }
 0x25b   : > { %1751 = vmatpush3.bf16.xpose.msra.mxu1 %v1030_v27  ;;  %1752 = vmatprep.mubr.msk.bf16.mxu1 %vm2251_vm1, %v2250_v0  ;;  %v1166_v28 = vpop.permute.xlu0 %1165  ;;  %v1164_v31 = vpop.permute.xlu1 %1163 }
 0x25c   : > { %1762 = vmatprep.subr.bf16.mxu1 %v2250_v0  ;;  %v1171_v30 = vsel %vm745_vm3, %v1166_v28, 0 }
 0x262   : > { %1753 = vmatmul.mubr.msk.bf16.vlgmr.msra.gmra.mrb[12].mxu1 %vm745_vm3, %v1023_v29 }
 0x263   : > { %1763 = vmatpush3.bf16.xpose.msra.mxu1 %v1171_v30  ;;  %1764 = vmatprep.mubr.msk.bf16.mxu1 %vm2251_vm1, %v2250_v0 }
 0x264   : > { %1774 = vmatprep.subr.bf16.mxu1 %v2250_v0 }
 0x26a   : > { %1765 = vmatmul.mubr.msk.bf16.vlgmr.msra.gmra.mrb[16].mxu1 %vm745_vm3, %v1164_v31 }
 0x26b   : > { %1778 = vmatprep.mubr.msk.bf16.mxu1 %vm2251_vm1, %v2250_v0 }
 0x2ba   : > { %v786_v34 = vpop.f32.mrb[4].mxu1 }
 0x2bb   : > { %v2723_v35 = vmul.f32 %v1667_v33, %v786_v34  ;;  %v1730_v36 = vpop.f32.mrb[5].mxu1 }
 0x2bc   : > { %v789_v37 = vpop.f32.mrb[6].mxu1 }
 0x2bd   : > { %v1731_v38 = vpop.f32.mrb[7].mxu1  ;;  %v795_v39 = vsel %vm745_vm3, %v2723_v35, -inf }
 0x2be   : > { %796 = vmax.xlane.f32.xlu0 %v795_v39 }
 0x32d   : > { %v924_v43 = vpop.f32.mrb[8].mxu1 }
 0x32e   : > { %v2739_v44 = vmul.f32 %v1668_v42, %v924_v43  ;;  %v1742_v45 = vpop.f32.mrb[9].mxu1 }
 0x32f   : > { %v927_v46 = vpop.f32.mrb[10].mxu1 }
 0x330   : > { %v1743_v48 = vpop.f32.mrb[11].mxu1  ;;  %v934_v49 = vsel %vm745_vm3, %v2739_v44, -inf }
 0x331   : > { %935 = vmax.xlane.f32.xlu1 %v934_v49 }
 0x335   : > { %v1066_v51 = vpop.f32.mrb[12].mxu1 }
 0x336   : > { %v2744_v52 = vmul.f32 %v1671_v50, %v1066_v51  ;;  %v1754_v53 = vpop.f32.mrb[13].mxu1 }
 0x337   : > { %v1069_v54 = vpop.f32.mrb[14].mxu1 }
 0x338   : > { %v1755_v55 = vpop.f32.mrb[15].mxu1  ;;  %v1076_v56 = vsel %vm745_vm3, %v2744_v52, -inf }
 0x339   : > { %1077 = vmax.xlane.f32.xlu0 %v1076_v56 }
 0x33d   : > { %v1207_v58 = vpop.f32.mrb[16].mxu1 }
 0x33e   : > { %v2748_v59 = vmul.f32 %v1672_v57, %v1207_v58  ;;  %v1766_v60 = vpop.f32.mrb[17].mxu1 }
 0x33f   : > { %v1210_v61 = vpop.f32.mrb[18].mxu1  ;;  %v810_v60 = vld [vmem:[#allocation4] sm:$0xff] }
 0x340   : > { %v1767_v62 = vpop.f32.mrb[19].mxu1  ;;  %v1217_v63 = vsel %vm745_vm3, %v2748_v59, -inf }
 0x341   : > { %1218 = vmax.xlane.f32.xlu0 %v1217_v63 }
 0x34b   : > { %v797_v2 = vpop.xlane.xlu0 %796 }
 0x34c   : > { %v2755_v3 = vmax.f32 %v2752_v1, %v797_v2 }
 0x34e   : > { %v799_v6 = vsub.f32 %v2752_v1, %v2755_v3  ;;  %818 = vst.msk [vmem:[#allocation3] sm:$0xff] %vm607_vm4, %v2755_v3  ;;  %804 = vperm.xlu1 %1902, %v2755_v3  }
 0x350   : > { %v800_v46 = vmul.f32 1.442695, %v799_v6 }
 0x3be   : > { %v936_v12 = vpop.xlane.xlu1 %935 }
 0x3bf   : > { %v2767_v13 = vmax.f32 %v2764_v11, %v936_v12  ;;  %v1092_v12 = vld [vmem:[#allocation4 + $0x10] sm:$0xff] }
 0x3c1   : > { %v938_v14 = vsub.f32 %v2764_v11, %v2767_v13  ;;  %957 = vst.msk [vmem:[#allocation3 + $0x8] sm:$0xff] %vm607_vm4, %v2767_v13  ;;  %943 = vperm.xlu0 %1903, %v2767_v13   ;;  %v867_v13 = vld [vmem:[#allocation5] sm:$0xff] }
 0x3c3   : > { %v939_v51 = vmul.f32 1.442695, %v938_v14 }
 0x3c6   : > { %v1078_v16 = vpop.xlane.xlu0 %1077 }
 0x3c7   : > { %v1079_v17 = vmax.f32 %v2774_v15, %v1078_v16 }
 0x3c9   : > { %v1080_v18 = vsub.f32 %v2774_v15, %v1079_v17  ;;  %1099 = vst.msk [vmem:[#allocation3 + $0x10] sm:$0xff] %vm607_vm4, %v1079_v17  ;;  %1085 = vperm.xlu1 %1902, %v1079_v17  }
 0x3cd   : > { %v805_v19 = vpop.permute.xlu1 %804  ;;  %960 = vrot.lane.b32.xlu1 %v739_v9, %s2252_s8  ;;  %s2145_s8 = sshll.u32 %s2260_s21, 4  ;;  %s2146_s8 = int_to_ptr.vmem [resolvable:$false] %s2145_s8 }
 0x3ce   : > { %v807_v21 = vsub.f32 %v2723_v35, %v805_v19  ;;  %v1219_v22 = vpop.xlane.xlu0 %1218  ;;  %p2148_p9 = scmp.lt.s32.totalorder %s2833_s12, %s2146_s8 }
 0x3cf   : > { %v1220_v24 = vmax.f32 %v1216_v20, %v1219_v22 }
 0x3d0   : > { %v808_v23 = vmul.f32 1.442695, %v807_v21 }
 0x3d1   : > { %v1221_v25 = vsub.f32 %v1216_v20, %v1220_v24  ;;  %1240 = vst.msk [vmem:[#allocation3 + $0x18] sm:$0xff] %vm607_vm4, %v1220_v24  ;;  %1226 = vperm.xlu1 %1902, %v1220_v24  }
 0x3d2   : > { %1913 = vpow2.f32 %v808_v23  ;;  %v1233_v23 = vld [vmem:[#allocation4 + $0x18] sm:$0xff] }
 0x3d3   : > { %v1222_v54 = vmul.f32 1.442695, %v1221_v25 }
 0x3d5   : > { %1101 = vrot.lane.b32.xlu1 %v739_v9, %s2253_s24  ;;  %s2147_s24 = scalar_lea.vmem %s2146_s8, 256 }
 0x3d6   : > { %p2149_p10 = scmp.lt.s32.totalorder %s2147_s24, %s2141_s29 }
 0x3d8   : > { %p2150_p5 = por %p2149_p10, %p2148_p9 }
 0x3d9   : > { %1242 = vrot.lane.b32.xlu1 %v739_v9, %s2254_s23 }
 0x3da   : > { %p2151_p7 = pnand %p2150_p5, %p2144_p0 }
 0x3dc   : > { %v1914_v26 = vpop.eup %1913 }
 0x3dd   : > { %v819_v27 = vpack.c.bf16 %v1914_v26, %v1914_v26  ;;  %v812_v28 = vsel %vm745_vm3, %v1914_v26, 0.0 }
 0x3df   : > { %1735 = vmatmul.mubr.msk.bf16.vlgmr.msra.gmra.mrb[8].mxu0 %vm745_vm3, %v819_v27 }
 0x3e0   : > { %1746 = vmatprep.mubr.msk.bf16.mxu0 %vm2251_vm1, %v2250_v0 }
 0x3fd   : > { %813 = vadd.xlane.f32.xlu1 %v812_v28 }
 0x440   : > { %v944_v29 = vpop.permute.xlu0 %943 }
 0x441   : > { %v946_v30 = vsub.f32 %v2739_v44, %v944_v29 }
 0x443   : > { %v947_v31 = vmul.f32 1.442695, %v946_v30 }
 0x445   : > { %1915 = vpow2.f32 %v947_v31 }
 0x448   : > { %v1086_v32 = vpop.permute.xlu1 %1085 }
 0x449   : > { %v1088_v33 = vsub.f32 %v2744_v52, %v1086_v32  ;;  %v1081_v52 = vmul.f32 1.442695, %v1080_v18 }
 0x44b   : > { %v1089_v34 = vmul.f32 1.442695, %v1088_v33 }
 0x44c   : > { %v961_v35 = vpop.permute.xlu1 %960 }
 0x44d   : > { %1917 = vpow2.f32 %v1089_v34  ;;  %v966_v36 = vsel %vm823_vm5, %v961_v35, 0 }
 0x44e   : > { %1745 = vmatpush3.bf16.msra.mxu0 %v966_v36 }
 0x44f   : > { %v1916_v37 = vpop.eup %1915  ;;  %1756 = vmatprep.subr.bf16.mxu0 %v2250_v0 }
 0x450   : > { %v1227_v38 = vpop.permute.xlu1 %1226  ;;  %v952_v39 = vsel %vm745_vm3, %v1916_v37, 0.0  ;;  %v958_v40 = vpack.c.bf16 %v1916_v37, %v1916_v37 }
 0x451   : > { %v1229_v41 = vsub.f32 %v2748_v59, %v1227_v38  ;;  %953 = vadd.xlane.f32.xlu0 %v952_v39 }
 0x452   : > { %1747 = vmatmul.mubr.msk.bf16.vlgmr.msra.gmra.mrb[12].mxu0 %vm745_vm3, %v958_v40 }
 0x453   : > { %v1230_v42 = vmul.f32 1.442695, %v1229_v41  ;;  %1758 = vmatprep.mubr.msk.bf16.mxu0 %vm2251_vm1, %v2250_v0 }
 0x454   : > { %v1102_v43 = vpop.permute.xlu1 %1101 }
 0x455   : > { %1919 = vpow2.f32 %v1230_v42  ;;  %v1107_v44 = vsel %vm823_vm5, %v1102_v43, 0  ;;  %v1911_v43 = vld [vmem:[#allocation17] sm:$0xff]  }
 0x456   : > { %1757 = vmatpush3.bf16.msra.mxu0 %v1107_v44  ;;  %1921 = vpow2.f32 %v800_v46  ;;  %1775 = vmatpush3.bf16.msra.mxu1 %v1911_v43  ;;  %v1912_v44 = vld [vmem:[#allocation17 + $0x8] sm:$0xff]  }
 0x457   : > { %v1918_v45 = vpop.eup %1917  ;;  %1768 = vmatprep.subr.bf16.mxu0 %v2250_v0  ;;  %1923 = vpow2.f32 %v939_v51  ;;  %1776 = vmatprep.subr.bf16.mxu1 %v2250_v0 }
 0x458   : > { %v1243_v47 = vpop.permute.xlu1 %1242  ;;  %v1094_v48 = vsel %vm745_vm3, %v1918_v45, 0.0  ;;  %v1100_v49 = vpack.c.bf16 %v1918_v45, %v1918_v45  ;;  %1925 = vpow2.f32 %v1081_v52 }
 0x459   : > { %v1248_v50 = vsel %vm823_vm5, %v1243_v47, 0  ;;  %1095 = vadd.xlane.f32.xlu1 %v1094_v48  ;;  %1927 = vpow2.f32 %v1222_v54 }
 0x45a   : > { %1759 = vmatmul.mubr.msk.bf16.vlgmr.msra.gmra.mrb[16].mxu0 %vm745_vm3, %v1100_v49  ;;  %1777 = vmatpush3.bf16.msra.mxu1 %v1912_v44 }
 0x45b   : > { %1769 = vmatpush3.bf16.msra.mxu0 %v1248_v50  ;;  %1770 = vmatprep.mubr.msk.bf16.mxu0 %vm2251_vm1, %v2250_v0 }
 0x45f   : > { %v1920_v53 = vpop.eup %1919 }
 0x460   : > { %v1241_v55 = vpack.c.bf16 %v1920_v53, %v1920_v53  ;;  %v1922_v56 = vpop.eup %1921  ;;  %v1235_v1 = vsel %vm745_vm3, %v1920_v53, 0.0 }
 0x461   : > { %v1924_v57 = vpop.eup %1923  ;;  %v811_v61 = vmul.f32 %v1922_v56, %v810_v60 }
 0x462   : > { %1771 = vmatmul.mubr.msk.bf16.vlgmr.msra.gmra.mrb[20].mxu0 %vm745_vm3, %v1241_v55  ;;  %v1926_v58 = vpop.eup %1925  ;;  %v951_v9 = vmul.f32 %v1924_v57, %v950_v8 }
 0x463   : > { %v1928_v59 = vpop.eup %1927  ;;  %v1093_v14 = vmul.f32 %v1926_v58, %v1092_v12 }
 0x464   : > { %v1234_v24 = vmul.f32 %v1928_v59, %v1233_v23 }
 0x467   : > { %870 = vperm.xlu0 %1903, %v1922_v56  }
 0x46a   : > { %1011 = vperm.xlu1 %1902, %v1924_v57  }
 0x46b   : > { %1152 = vperm.xlu0 %1903, %v1926_v58  }
 0x46f   : > { %1293 = vperm.xlu0 %1903, %v1928_v59  }
 0x48a   : > { %v814_v62 = vpop.xlane.xlu1 %813 }
 0x48b   : > { %v815_v63 = vadd.f32 %v814_v62, %v811_v61 }
 0x48d   : > { %817 = vst.msk [vmem:[#allocation4] sm:$0xff] %vm607_vm4, %v815_v63 }
 0x48e   : > { %1236 = vadd.xlane.f32.xlu1 %v1235_v1 }
 0x494   : > { %v1307_v2 = vld [vmem:[#allocation4] sm:$0xff] }
 0x495   : > { %1929 = vrcp.f32 %v1307_v2 }
 0x49f   : > { %v1930_v3 = vpop.eup %1929 }
 0x4a0   : > { %1312 = vperm.xlu0 %1903, %v1930_v3  }
 0x4b2   : > { %v861_v4 = vpop.f32.mrb[8].mxu0 }
 0x4b3   : > { %v1736_v5 = vpop.f32.mrb[9].mxu0 }
 0x4b4   : > { %v864_v6 = vpop.f32.mrb[10].mxu0 }
 0x4b5   : > { %v1737_v7 = vpop.f32.mrb[11].mxu0 }
 0x4de   : > { %v954_v10 = vpop.xlane.xlu0 %953 }
 0x4df   : > { %v955_v11 = vadd.f32 %v954_v10, %v951_v9  ;;  %v1656_v9 = vld [vmem:[%s2955_s25] ss:$0 sm:$0xff] }
 0x4e1   : > { %956 = vst.msk [vmem:[#allocation4 + $0x8] sm:$0xff] %vm607_vm4, %v955_v11 }
 0x4e6   : > { %v871_v15 = vpop.permute.xlu0 %870  ;;  %v1096_v16 = vpop.xlane.xlu1 %1095 }
 0x4e7   : > { %v873_v17 = vmul.f32 %v871_v15, %v867_v13  ;;  %v1097_v18 = vadd.f32 %v1096_v16, %v1093_v14 }
 0x4e8   : > { %v1317_v31 = vld [vmem:[#allocation4 + $0x8] sm:$0xff] }
 0x4e9   : > { %v874_v19 = vadd.f32 %v873_v17, %v861_v4  ;;  %1098 = vst.msk [vmem:[#allocation4 + $0x10] sm:$0xff] %vm607_vm4, %v1097_v18 }
 0x4ea   : > { %v1012_v22 = vpop.permute.xlu1 %1011  ;;  %v1153_v49 = vpop.permute.xlu0 %1152 }
 0x4eb   : > { %875 = vst.msk [vmem:[#allocation5] sm:$0xff] %vm745_vm3, %v874_v19 }
 0x4ee   : > { %v1294_v54 = vpop.permute.xlu0 %1293 }
 0x4f0   : > { %v1327_v20 = vld [vmem:[#allocation4 + $0x10] sm:$0xff] }
 0x4f1   : > { %1931 = vrcp.f32 %v1327_v20 }
 0x4f2   : > { %1933 = vrcp.f32 %v1317_v31  ;;  %v1008_v45 = vld [vmem:[#allocation5] sm:$0xff] }
 0x4f3   : > { %v1014_v46 = vmul.f32 %v1012_v22, %v1008_v45 }
 0x4fb   : > { %v1932_v21 = vpop.eup %1931 }
 0x4fc   : > { %1332 = vperm.xlu0 %1903, %v1932_v21   ;;  %v1934_v41 = vpop.eup %1933 }
 0x51b   : > { %v1237_v25 = vpop.xlane.xlu1 %1236 }
 0x51c   : > { %v1238_v26 = vadd.f32 %v1237_v25, %v1234_v24 }
 0x51e   : > { %1239 = vst.msk [vmem:[#allocation4 + $0x18] sm:$0xff] %vm607_vm4, %v1238_v26 }
 0x51f   : > { %v1313_v58 = vpop.permute.xlu0 %1312 }
 0x525   : > { %v1002_v27 = vpop.f32.mrb[12].mxu0  ;;  %v1337_v36 = vld [vmem:[#allocation4 + $0x18] sm:$0xff] }
 0x526   : > { %1016 = vrot.lane.b32.xlu1 %v1002_v27, %s2257_s22  ;;  %v1748_v28 = vpop.f32.mrb[13].mxu0  ;;  %1935 = vrcp.f32 %v1337_v36 }
 0x527   : > { %v1005_v29 = vpop.f32.mrb[14].mxu0 }
 0x528   : > { %v1749_v30 = vpop.f32.mrb[15].mxu0 }
 0x52d   : > { %v1143_v32 = vpop.f32.mrb[16].mxu0 }
 0x52e   : > { %1157 = vrot.lane.b32.xlu1 %v1143_v32, %s2258_s5  ;;  %v1760_v33 = vpop.f32.mrb[17].mxu0 }
 0x52f   : > { %v1146_v34 = vpop.f32.mrb[18].mxu0 }
 0x530   : > { %v1761_v35 = vpop.f32.mrb[19].mxu0  ;;  %v1936_v42 = vpop.eup %1935 }
 0x535   : > { %v1284_v37 = vpop.f32.mrb[20].mxu0 }
 0x536   : > { %1298 = vrot.lane.b32.xlu1 %v1284_v37, %s2259_s6  ;;  %v1772_v38 = vpop.f32.mrb[21].mxu0 }
 0x537   : > { %v1287_v39 = vpop.f32.mrb[22].mxu0 }
 0x538   : > { %v1773_v40 = vpop.f32.mrb[23].mxu0 }
 0x53a   : > { %1322 = vperm.xlu1 %1902, %v1934_v41  }
 0x53e   : > { %1342 = vperm.xlu1 %1902, %v1936_v42  }
 0x57b   : > { %v1333_v1 = vpop.permute.xlu0 %1332 }
 0x598   : > { %v1017_v47 = vpop.permute.xlu1 %1016 }
 0x599   : > { %v1019_v48 = vadd.f32 %v1017_v47, %v1014_v46 }
 0x59b   : > { %1021 = vst.msk [vmem:[#allocation5] sm:$0xff] %vm1020_vm6, %v1019_v48 }
 0x5a0   : > { %v1158_v52 = vpop.permute.xlu1 %1157 }
 0x5a2   : > { %v1149_v50 = vld [vmem:[#allocation5] sm:$0xff] }
 0x5a3   : > { %v1155_v51 = vmul.f32 %v1153_v49, %v1149_v50 }
 0x5a5   : > { %v1160_v53 = vadd.f32 %v1158_v52, %v1155_v51 }
 0x5a7   : > { %1162 = vst.msk [vmem:[#allocation5] sm:$0xff] %vm1161_vm7, %v1160_v53 }
 0x5a8   : > { %v1299_v0 = vpop.permute.xlu1 %1298 }
 0x5ae   : > { %v1290_v55 = vld [vmem:[#allocation5] sm:$0xff] }
 0x5af   : > { %v1296_v56 = vmul.f32 %v1294_v54, %v1290_v55 }
 0x5b1   : > { %v1301_v57 = vadd.f32 %v1299_v0, %v1296_v56 }
 0x5b3   : > { %1303 = vst.msk [vmem:[#allocation5] sm:$0xff] %vm1302_vm8, %v1301_v57 }
 0x5b9   : > { %v1323_v62 = vpop.permute.xlu1 %1322 }
 0x5ba   : > { %v1309_v59 = vld [vmem:[#allocation5] sm:$0xff] }
 0x5bb   : > { %v1315_v60 = vmul.f32 %v1313_v58, %v1309_v59 }
 0x5bd   : > { %1316 = vst.msk [vmem:[#allocation5] sm:$0xff] %vm745_vm3, %v1315_v60  ;;  %v1343_v5 = vpop.permute.xlu1 %1342 }
 0x5c4   : > { %v1319_v61 = vld [vmem:[#allocation5] sm:$0xff] }
 0x5c5   : > { %v1325_v63 = vmul.f32 %v1323_v62, %v1319_v61 }
 0x5c7   : > { %1326 = vst.msk [vmem:[#allocation5] sm:$0xff] %vm1020_vm6, %v1325_v63 }
 0x5ce   : > { %v1329_v2 = vld [vmem:[#allocation5] sm:$0xff] }
 0x5cf   : > { %v1335_v3 = vmul.f32 %v1333_v1, %v1329_v2 }
 0x5d1   : > { %1336 = vst.msk [vmem:[#allocation5] sm:$0xff] %vm1161_vm7, %v1335_v3 }
 0x5d8   : > { %v1339_v4 = vld [vmem:[#allocation5] sm:$0xff] }
 0x5d9   : > { %v1345_v6 = vmul.f32 %v1343_v5, %v1339_v4 }
 0x5db   : > { %1346 = vst.msk [vmem:[#allocation5] sm:$0xff] %vm1302_vm8, %v1345_v6 }
 0x5e2   : > { %v1347_v7 = vld [vmem:[#allocation5] sm:$0xff] }
 0x5e3   : > { %v1348_v8 = vpack.c.bf16 %v1347_v7, %v1347_v7 }
 0x5e5   : > { %1779 = vmatmul.mubr.msk.bf16.vlgmr.msra.gmra.mrb[20].mxu1 %vm560_vm0, %v1348_v8 }
 0x6b8   : > { %v1409_v10 = vpop.f32.mrb[20].mxu1 }
 0x6b9   : > { %v1410_v11 = vadd.f32 %v1656_v9, %v1409_v10  ;;  %v1780_v12 = vpop.f32.mrb[21].mxu1 }
 0x6ba   : > { %v1412_v13 = vpop.f32.mrb[22].mxu1 }
 0x6bb   : > { %v1781_v14 = vpop.f32.mrb[23].mxu1  ;;  %1415 = vst.msk [vmem:[%s537_s26] sm:$0xff] %vm560_vm0, %v1410_v11 }
 0x6bc   : > { %2154 = shalt.err (!%p2151_p7)
}
 0x6bd   : > { %s2155_s18 = scalar_lea.hbm %s2831_s15, 128  ;;  %s2159_s5 = scalar_lea.hbm %s2958_s7, 256 }
 0x6be   : > { %p2156_p6 = scmp.ne.s32.totalorder %s2831_s15, %s2155_s18  ;;  %p2160_p4 = scmp.lt.u32.totalorder %s2831_s15, %s2958_s7 }
 0x6bf   : > { %p2161_p1 = scmp.lt.u32.totalorder %s2159_s5, %s2155_s18  ;;  %p2163_p13 = scmp.lt.u32.totalorder %s2155_s18, %s2831_s15 }
 0x6c0   : > { %p2157_p11 = pnand %p2156_p6, %p2959_p12 }
 0x6c1   : > { %p2162_p8 = por %p2161_p1, %p2160_p4 }
 0x6c2   : > { %p2158_p2 = pneg %p2157_p11 }
 0x6c3   : > { %p2164_p3 = por %p2163_p13, %p2162_p8 }
 0x6c5   : > { %p2165_p0 = pnand %p2164_p3, %p2158_p2 }
 0x6c7   : > { %2168 = shalt.err (!%p2165_p0)
}
 0x6c8   : > { %1802 = dma.vmem_to_hbm [thread:$0]  (%p2959_p12), %s2833_s12, 128, %s2831_s15, %s1417_s17  }
 0x6c9 PF: > { %s2960_s4 = sld [smem:[#allocation25_spill]]  ;;  %s2961_s9 = sld [smem:[#allocation28_spill]] }
 0x6ca   : > { %p2963_p10 = scmp.ge.s32.totalorder %s2239_s14, 2 }
 0x6cf   : > { %s1443_s20 = sand.u32 1, %s2960_s4   ;;  %p2962_p9 = scmp.ne.s32.totalorder %s2961_s9, 0 }
 0x6d0   : > { %s1444_s25 = scalar_lea.sflag [#allocation8], %s1443_s20 }
 0x6d1   : > { %p1828_p5 = pnand %p2963_p10, %p2962_p9 }
 0x6d3   : > { %2214 = dma.done.wait (!%p1828_p5), %s1444_s25, 128  }
 0x6d4   : > { %2216 = vsyncadd (!%p1828_p5), %s1444_s25, 4294967168  ;;  %s32_s14 = sadd.s32 1, %s2239_s14   ;;  %s2964_s19 = sld [smem:[#allocation26_spill]] }
 0x6d5   : > { %p29_p7 = scmp.ge.s32.totalorder %s32_s14, 4   ;;  %s2965_s11 = sld [smem:[#allocation31_spill]] }
 0x6d6   : > { %s2966_s26 = sld [smem:[#allocation29_spill]]  ;;  %s2967_s30 = smov %s2223_s10 }
 0x6d7   : > { %s2969_s12 = smov %s2235_s13  ;;  %31 = sbr.rel (!%p29_p7) target bundleno = 19 (0x13), region = 164 }
 0x6da   : > { %s2968_s10 = smov %s2964_s19 }
 0x6dc   : > { %s2970_s13 = smov %s2966_s26 }
 0x6de   :  { %1449 = vsyncpa [#allocation7], 1 }
 0x6df   :  { %1451 = vsyncpa [#allocation7 + $0x1], 1 }
 0x6e0   :  { %1452 = vsyncpa [#allocation10], 1 }
 0x6e1   :  { %1454 = vsyncpa [#allocation10 + $0x1], 1 }
 0x6e2   :  { %1455 = vsyncpa [#allocation13], 1 }
 0x6e3   :  { %1457 = vsyncpa [#allocation13 + $0x1], 1 }
 0x6e4   :  { %1458 = vsyncpa [#allocation16], 1 }
 0x6e5   :  { %1459 = vsyncpa [#allocation8], 1 }
 0x6e6   :  { %1461 = vsyncpa [#allocation8 + $0x1], 1 }

</bundles_post_ra>
